<compile_context>
chip_gen: v6e
topology: v6e:2x2x1
jax: 0.10.0
libtpu: 0.0.40
codegen_flags: <defaults>
</compile_context>

<pallas_src>
import functools
import math

import jax
import jax.numpy as jnp
from jax.experimental import pallas as pl
from jax.experimental.pallas import tpu as pltpu


def _round_up(v, m):
    return (v + m - 1) // m * m


def _conv_bn_relu_kernel(x_ref, w_ref, bias_ref, o_ref, *,
                         B, H, W, KH, KW, Ho, Wo, Cin,
                         stride, padding, dilation):
    """One grid step: B images, full spatial extent, all (padded) out-channels.

    x_ref:    (B, H, W*Cin)      unpadded input images, lane-dense layout
    w_ref:    (KH*KW*Cin, Cpad)  BN-folded conv weights, Cout zero-padded
    bias_ref: (1, Cpad)          BN-folded bias (f32)
    o_ref:    (B, Ho*Wo, Cpad)   lane-dense output (minor dim multiple of 128)
    """
    # Un-flatten once (single relayout of the small input block; the HBM->VMEM
    # DMA stays dense because the block minor dim is W*Cin, not Cin).
    x = x_ref[...].reshape(B, H, W, Cin)

    # Spatial zero-padding fused into the kernel (saves a wrapper HBM pass).
    if padding > 0:
        zh = jnp.zeros((B, padding, W, Cin), x.dtype)
        x = jnp.concatenate([zh, x, zh], axis=1)            # (B, Hp, W,  Cin)
        zw = jnp.zeros((B, H + 2 * padding, padding, Cin), x.dtype)
        x = jnp.concatenate([zw, x, zw], axis=2)            # (B, Hp, Wp, Cin)

    # im2col: ONE concat of the KH*KW taps along the channel axis and ONE
    # reshape. Column order (kh, kw, cin) matches the wrapper's weight layout.
    taps = []
    for kh in range(KH):
        for kw in range(KW):
            h0 = kh * dilation
            w0 = kw * dilation
            taps.append(jax.lax.slice(
                x,
                (0, h0, w0, 0),
                (B, h0 + (Ho - 1) * stride + 1,
                 w0 + (Wo - 1) * stride + 1, Cin),
                (1, stride, stride, 1)))                     # (B, Ho, Wo, Cin)
    patches = jnp.concatenate(taps, axis=-1)                 # (B, Ho, Wo, K)
    patches = patches.reshape(B * Ho * Wo, KH * KW * Cin)    # (M, K)

    # Single MXU matmul, f32 accumulation. Zero-padded Cout columns are free on
    # the MXU and keep the result FIFO pops and the stores lane-dense.
    acc = jnp.dot(patches, w_ref[...],
                  preferred_element_type=jnp.float32)        # (M, Cpad)

    # Epilogue: folded BN bias + ReLU, then an unmasked lane-dense store.
    y = jnp.maximum(acc + bias_ref[...], 0.0)
    o_ref[...] = y.reshape(B, Ho * Wo, o_ref.shape[-1]).astype(o_ref.dtype)


def basic_conv2d_relu(x, weight_oihw, *, stride=1, padding=0, dilation=1,
                      bn_eps=1e-5, gamma=None, beta=None,
                      running_mean=None, running_var=None,
                      compute_dtype=None, images_per_step=None,
                      data_format="NCHW"):
    """Fused Conv2d(bias=False) + BatchNorm2d(eval) + ReLU.

    data_format="NCHW" matches the PyTorch module; "NHWC" skips both layout
    transposes (use it when the surrounding model can run channels-last).
    compute_dtype=jnp.bfloat16 halves operand DMA/VMEM bytes on v6e/v7x
    (accumulation stays f32); default None keeps exact f32 parity.
    """
    if data_format == "NCHW":
        N, Cin, H, W = x.shape
        x_nhwc = jnp.transpose(x, (0, 2, 3, 1))
    elif data_format == "NHWC":
        N, H, W, Cin = x.shape
        x_nhwc = x
    else:
        raise ValueError(f"bad data_format: {data_format}")
    Cout, Cin_w, KH, KW = weight_oihw.shape
    assert Cin == Cin_w

    Ho = (H + 2 * padding - dilation * (KH - 1) - 1) // stride + 1
    Wo = (W + 2 * padding - dilation * (KW - 1) - 1) // stride + 1
    K = KH * KW * Cin

    # --- BN (eval mode) folded into per-channel scale/bias, then into weights.
    if gamma is None:
        gamma = jnp.ones((Cout,), jnp.float32)
    if beta is None:
        beta = jnp.zeros((Cout,), jnp.float32)
    if running_mean is None:
        running_mean = jnp.zeros((Cout,), jnp.float32)
    if running_var is None:
        running_var = jnp.ones((Cout,), jnp.float32)
    bn_scale = gamma / jnp.sqrt(running_var + bn_eps)             # (Cout,)
    bn_bias = beta - running_mean * bn_scale                      # (Cout,)

    # Pad Cout to a multiple of 128 -> lane-dense GEMM result + unmasked vst.
    Cpad = int(pl.cdiv(Cout, 128) * 128)
    w_hwio = jnp.transpose(weight_oihw, (2, 3, 1, 0)) * bn_scale  # (KH,KW,Cin,Cout)
    w_folded = w_hwio.reshape(K, Cout).astype(jnp.float32)
    bias = bn_bias.reshape(1, Cout).astype(jnp.float32)
    if Cpad != Cout:
        w_folded = jnp.pad(w_folded, ((0, 0), (0, Cpad - Cout)))
        bias = jnp.pad(bias, ((0, 0), (0, Cpad - Cout)))

    # Lane-dense input presentation (free reshape: NHWC is contiguous in W,C).
    x_flat = x_nhwc.reshape(N, H, W * Cin)
    if compute_dtype is not None:
        x_flat = x_flat.astype(compute_dtype)
        w_folded = w_folded.astype(compute_dtype)
    cd = jnp.dtype(x_flat.dtype)
    out_dtype = x.dtype

    # --- images per grid step: small blocks (<= ~2 MiB) and >= 4 grid steps
    # when possible (steady-state pipelining; both v7x TensorCores fed).
    if images_per_step is None:
        img_bytes = H * _round_up(W * Cin, 128) * cd.itemsize
        cap = max(1, min((2 << 20) // max(img_bytes, 1), max(N // 4, 1), N))
        B = 1
        for cand in range(cap, 0, -1):
            if N % cand == 0:
                B = cand
                break
    else:
        B = int(images_per_step)
    assert N % B == 0
    grid = (N // B,)

    kernel = functools.partial(
        _conv_bn_relu_kernel,
        B=B, H=H, W=W, KH=KH, KW=KW, Ho=Ho, Wo=Wo, Cin=Cin,
        stride=stride, padding=padding, dilation=dilation)

    # Rough per-step VMEM budget (double-buffered blocks + 9x im2col expansion)
    # -> explicit scoped-VMEM limit (v5e default is only 16 MiB; cap well below
    # v7x's 64 MiB physical VMEM).
    blk_x = B * H * _round_up(W * Cin, 128) * cd.itemsize
    blk_w = _round_up(K, 8) * Cpad * cd.itemsize
    patches_b = B * Ho * Wo * _round_up(K, 128) * cd.itemsize
    acc_b = B * Ho * Wo * Cpad * 4
    blk_o = B * Ho * Wo * Cpad * jnp.dtype(out_dtype).itemsize
    est = 2 * blk_x + 2 * blk_w + patches_b + 2 * acc_b + 2 * blk_o + (1 << 20)
    vmem_limit = int(min(max(3 * est, 32 << 20), 48 << 20))

    flops = 2 * N * Ho * Wo * K * Cpad
    bytes_accessed = (x_flat.size * cd.itemsize
                      + w_folded.size * cd.itemsize + bias.size * 4
                      + N * Ho * Wo * Cpad * jnp.dtype(out_dtype).itemsize)

    # NOTE: weight/bias blocks are grid-invariant (fetched once). Single-
    # buffering them (pl.Buffered(1)) would halve their VMEM reservation at
    # large Cout; skipped here since it is negligible at these sizes.
    # TODO(synk): for large feature maps add an Ho grid axis with a (KH-1)*dil
    # input halo (manual DMA) so a row-tile + its im2col expansion fits v7x's
    # 64 MiB VMEM; unnecessary at these shapes.
    out_flat = pl.pallas_call(
        kernel,
        out_shape=jax.ShapeDtypeStruct((N, Ho * Wo, Cpad), out_dtype),
        grid_spec=pltpu.PrefetchScalarGridSpec(
            num_scalar_prefetch=0,
            grid=grid,
            in_specs=[
                pl.BlockSpec((B, H, W * Cin), lambda n: (n, 0, 0)),
                pl.BlockSpec((K, Cpad), lambda n: (0, 0)),
                pl.BlockSpec((1, Cpad), lambda n: (0, 0)),
            ],
            out_specs=pl.BlockSpec((B, Ho * Wo, Cpad), lambda n: (n, 0, 0)),
        ),
        compiler_params=pltpu.CompilerParams(
            dimension_semantics=("parallel",),
            vmem_limit_bytes=vmem_limit),
        cost_estimate=pl.CostEstimate(
            flops=flops, transcendentals=0, bytes_accessed=bytes_accessed),
    )(x_flat, w_folded, bias)

    out_nhwc = out_flat[..., :Cout].reshape(N, Ho, Wo, Cout)
    if data_format == "NCHW":
        return jnp.transpose(out_nhwc, (0, 3, 1, 2))
    return out_nhwc


def _reference(x_nchw, weight_oihw, *, stride, padding, dilation, bn_eps=1e-5):
    y = jax.lax.conv_general_dilated(
        x_nchw, weight_oihw,
        window_strides=(stride, stride),
        padding=((padding, padding), (padding, padding)),
        rhs_dilation=(dilation, dilation),
        dimension_numbers=("NCHW", "OIHW", "NCHW"))
    y = y / jnp.sqrt(1.0 + bn_eps)   # BN eval: mean=0, var=1, gamma=1, beta=0
    return jnp.maximum(y, 0.0)


if __name__ == "__main__":
    key = jax.random.PRNGKey(0)
    kx, kw = jax.random.split(key)

    # Module config: BasicConv2drelu(in_planes=4, out_planes=8, kernel_size=3,
    #                                stride=1, padding=1, dilation=1)
    N, Cin, H, W = 2, 4, 16, 16
    Cout, KH, KW = 8, 3, 3
    stride, padding, dilation = 1, 1, 1

    x = jax.random.normal(kx, (N, Cin, H, W), dtype=jnp.float32)

    # kaiming_normal_(nonlinearity='relu'): std = sqrt(2 / fan_in),
    # fan_in = Cin * KH * KW (deterministic synthetic init, no checkpoint).
    fan_in = Cin * KH * KW
    std = math.sqrt(2.0 / fan_in)
    weight = std * jax.random.normal(kw, (Cout, Cin, KH, KW), dtype=jnp.float32)

    ref = _reference(x, weight, stride=stride, padding=padding,
                     dilation=dilation)

    # f32 operands: exact parity with the PyTorch module's numerics.
    out = basic_conv2d_relu(x, weight, stride=stride, padding=padding,
                            dilation=dilation)
    out = jax.block_until_ready(out)
    assert out.shape == ref.shape == (N, Cout, H, W)
    assert jnp.allclose(out, ref, atol=1e-4, rtol=1e-4)

    # bf16 operands (f32 accumulation) — recommended on v6e/v7x; loose-tol
    # smoke check only (deviates from fp32 PyTorch numerics by design).
    out_bf16 = basic_conv2d_relu(x, weight, stride=stride, padding=padding,
                                 dilation=dilation,
                                 compute_dtype=jnp.bfloat16)
    out_bf16 = jax.block_until_ready(out_bf16)
    assert jnp.allclose(out_bf16, ref, atol=1e-1, rtol=1e-1)

    print("KERNEL_OK")
</pallas_src>

<mosaic_0001>
module attributes {stable_mosaic.version = 11 : i64} {
  func.func @_conv_bn_relu_kernel(%arg0: i32, %arg1: memref<1x16x64xf32, #tpu.memory_space<vmem>>, %arg2: memref<36x128xf32, #tpu.memory_space<vmem>>, %arg3: memref<1x128xf32, #tpu.memory_space<vmem>>, %arg4: memref<1x256x128xf32, #tpu.memory_space<vmem>>) attributes {dimension_semantics = [#tpu.dimension_semantics<parallel>], iteration_bounds = array<i64: 2>, scalar_prefetch = 0 : i64, scratch_operands = 0 : i64, tpu.core_type = #tpu.core_type<tc>, window_params = [{transform_indices = @transform_0, window_bounds = array<i64: 1, 16, 64>}, {pipeline_mode = #tpu.pipeline_mode<synchronous>, transform_indices = @transform_1, window_bounds = array<i64: 36, 128>}, {pipeline_mode = #tpu.pipeline_mode<synchronous>, transform_indices = @transform_2, window_bounds = array<i64: 1, 128>}, {transform_indices = @transform_3, window_bounds = array<i64: 1, 256, 128>}]} {
    %c0 = arith.constant 0 : index
    %c0_0 = arith.constant 0 : index
    %c0_1 = arith.constant 0 : index
    %0 = vector.load %arg1[%c0, %c0_0, %c0_1] : memref<1x16x64xf32, #tpu.memory_space<vmem>>, vector<1x16x64xf32>
    %1 = vector.shape_cast %0 : vector<1x16x64xf32> to vector<1x16x16x4xf32>
    %cst = arith.constant 0.000000e+00 : f32
    %2 = vector.broadcast %cst : f32 to vector<1x1x16x4xf32>
    %3 = tpu.concatenate %2, %1, %2 in 1 : vector<1x1x16x4xf32>, vector<1x16x16x4xf32>, vector<1x1x16x4xf32> -> vector<1x18x16x4xf32>
    %cst_2 = arith.constant 0.000000e+00 : f32
    %4 = vector.broadcast %cst_2 : f32 to vector<1x18x1x4xf32>
    %5 = tpu.concatenate %4, %3, %4 in 2 : vector<1x18x1x4xf32>, vector<1x18x16x4xf32>, vector<1x18x1x4xf32> -> vector<1x18x18x4xf32>
    %6 = vector.extract_strided_slice %5 {offsets = [0, 0, 0, 0], sizes = [1, 16, 16, 4], strides = [1, 1, 1, 1]} : vector<1x18x18x4xf32> to vector<1x16x16x4xf32>
    %7 = vector.extract_strided_slice %5 {offsets = [0, 0, 1, 0], sizes = [1, 16, 16, 4], strides = [1, 1, 1, 1]} : vector<1x18x18x4xf32> to vector<1x16x16x4xf32>
    %8 = vector.extract_strided_slice %5 {offsets = [0, 0, 2, 0], sizes = [1, 16, 16, 4], strides = [1, 1, 1, 1]} : vector<1x18x18x4xf32> to vector<1x16x16x4xf32>
    %9 = vector.extract_strided_slice %5 {offsets = [0, 1, 0, 0], sizes = [1, 16, 16, 4], strides = [1, 1, 1, 1]} : vector<1x18x18x4xf32> to vector<1x16x16x4xf32>
    %10 = vector.extract_strided_slice %5 {offsets = [0, 1, 1, 0], sizes = [1, 16, 16, 4], strides = [1, 1, 1, 1]} : vector<1x18x18x4xf32> to vector<1x16x16x4xf32>
    %11 = vector.extract_strided_slice %5 {offsets = [0, 1, 2, 0], sizes = [1, 16, 16, 4], strides = [1, 1, 1, 1]} : vector<1x18x18x4xf32> to vector<1x16x16x4xf32>
    %12 = vector.extract_strided_slice %5 {offsets = [0, 2, 0, 0], sizes = [1, 16, 16, 4], strides = [1, 1, 1, 1]} : vector<1x18x18x4xf32> to vector<1x16x16x4xf32>
    %13 = vector.extract_strided_slice %5 {offsets = [0, 2, 1, 0], sizes = [1, 16, 16, 4], strides = [1, 1, 1, 1]} : vector<1x18x18x4xf32> to vector<1x16x16x4xf32>
    %14 = vector.extract_strided_slice %5 {offsets = [0, 2, 2, 0], sizes = [1, 16, 16, 4], strides = [1, 1, 1, 1]} : vector<1x18x18x4xf32> to vector<1x16x16x4xf32>
    %15 = tpu.concatenate %6, %7, %8, %9, %10, %11, %12, %13, %14 in 3 : vector<1x16x16x4xf32>, vector<1x16x16x4xf32>, vector<1x16x16x4xf32>, vector<1x16x16x4xf32>, vector<1x16x16x4xf32>, vector<1x16x16x4xf32>, vector<1x16x16x4xf32>, vector<1x16x16x4xf32>, vector<1x16x16x4xf32> -> vector<1x16x16x36xf32>
    %16 = vector.shape_cast %15 : vector<1x16x16x36xf32> to vector<256x36xf32>
    %c0_3 = arith.constant 0 : index
    %c0_4 = arith.constant 0 : index
    %17 = vector.load %arg2[%c0_3, %c0_4] : memref<36x128xf32, #tpu.memory_space<vmem>>, vector<36x128xf32>
    %cst_5 = arith.constant dense<0.000000e+00> : vector<256x128xf32>
    %18 = tpu.matmul %16, %17, %cst_5 {dimension_numbers = #tpu.dot_dimension_numbers<[1], [0], [0], [1], [0, 0, 1, 1], [], []>} : vector<256x36xf32>, vector<36x128xf32>, vector<256x128xf32> -> vector<256x128xf32>
    %c0_6 = arith.constant 0 : index
    %c0_7 = arith.constant 0 : index
    %19 = vector.load %arg3[%c0_6, %c0_7] : memref<1x128xf32, #tpu.memory_space<vmem>>, vector<1x128xf32>
    %20 = vector.broadcast %19 : vector<1x128xf32> to vector<256x128xf32>
    %21 = arith.addf %18, %20 : vector<256x128xf32>
    %cst_8 = arith.constant 0.000000e+00 : f32
    %22 = vector.broadcast %cst_8 : f32 to vector<256x128xf32>
    %23 = arith.maximumf %21, %22 : vector<256x128xf32>
    %24 = vector.shape_cast %23 : vector<256x128xf32> to vector<1x256x128xf32>
    %c0_9 = arith.constant 0 : index
    %c0_10 = arith.constant 0 : index
    %c0_11 = arith.constant 0 : index
    %25 = vector.load %arg4[%c0_9, %c0_10, %c0_11] : memref<1x256x128xf32, #tpu.memory_space<vmem>>, vector<1x256x128xf32>
    tpu.vector_store %arg4[%c0_9, %c0_10, %c0_11], %24 {strides = array<i32>} : memref<1x256x128xf32, #tpu.memory_space<vmem>>, vector<1x256x128xf32>,
    return
  }
  func.func @transform_0(%arg0: i32) -> (i32, i32, i32) {
    %c0_i32 = arith.constant 0 : i32
    %c0_i32_0 = arith.constant 0 : i32
    %c0_i32_1 = arith.constant 0 : i32
    return %arg0, %c0_i32, %c0_i32_0 : i32, i32, i32
  }
  func.func @transform_1(%arg0: i32) -> (i32, i32) {
    %c0_i32 = arith.constant 0 : i32
    %c0_i32_0 = arith.constant 0 : i32
    %c0_i32_1 = arith.constant 0 : i32
    return %c0_i32, %c0_i32_0 : i32, i32
  }
  func.func @transform_2(%arg0: i32) -> (i32, i32) {
    %c0_i32 = arith.constant 0 : i32
    %c0_i32_0 = arith.constant 0 : i32
    %c0_i32_1 = arith.constant 0 : i32
    return %c0_i32, %c0_i32_0 : i32, i32
  }
  func.func @transform_3(%arg0: i32) -> (i32, i32, i32) {
    %c0_i32 = arith.constant 0 : i32
    %c0_i32_0 = arith.constant 0 : i32
    %c0_i32_1 = arith.constant 0 : i32
    return %arg0, %c0_i32, %c0_i32_0 : i32, i32, i32
  }
}

</mosaic_0001>

<bundles_post_ra>
// kernel: tpu_custom_call.1
= control target key start
LH: loop header
LB: loop body
LE: loop exit
PB: predicated region body
PF: predicated region fallthrough
CT: control target
= control target key end

     0   :  { %8 = vsyncpa [#allocation3], 0  ;;  %s5439_s0 = inlined_call_operand.hbm [shape: f32[2,16,64], index: 0, kind: input, shape index: {}]   ;;  %s5440_s1 = inlined_call_operand.hbm [shape: f32[36,128], index: 1, kind: input, shape index: {}]   ;;  %s5441_s2 = inlined_call_operand.vmem [shape: f32[1,128], index: 2, kind: input, shape index: {}]   ;;  %s5442_s3 = inlined_call_operand.hbm [shape: f32[2,256,128], index: 3, kind: output, shape index: {}]  }
   0x1   :  { %10 = vsyncpa [#allocation3 + $0x1], 0 }
   0x2   :  { %11 = vsyncpa [#allocation6], 0 }
   0x3   :  { %12 = vsyncpa [#allocation4], 0 }
   0x4   :  { %14 = vsyncpa [#allocation4 + $0x1], 0  ;;  %s3190_s12 = smov 0   ;;  %s3192_s13 = smov 0  }
   0x5   :  { %s3194_s14 = smov 0   ;;  %s3196_s15 = smov 0  }
   0x6 LB: > { %s3211_s16 = sadd.s32 4294967295, %s3136_s15   ;;  %s2746_s17 = sadd.s32 4294967294, %s3136_s15   ;;  %s3136_s15 = sphi %s3196_s15, %s5902_s15   ;;  %s3132_s14 = sphi %s3194_s14, %s5901_s14   ;;  %s3128_s13 = sphi %s3192_s13, %s5900_s13   ;;  %s3124_s12 = sphi %s3190_s12, %s5899_s12  }
   0x7   : > { %p40_p0 = scmp.ne.s32.totalorder %s3128_s13, %s3124_s12  ;;  %p5443_p1 = scmp.eq.s32.totalorder %s3211_s16, 0 }
   0x8   : > { %p112_p3 = scmp.eq.s32.totalorder %s2746_s17, 1  ;;  %p2747_p5 = scmp.ge.s32.totalorder %s3136_s15, 1 }
   0x9   : > { %p3220_p4 = por %p5443_p1, %p40_p0  ;;  %p119_p7 = scmp.lt.s32.totalorder %s3136_s15, 3 }
   0xa   : > { %p3225_p6 = por %p112_p3, %p40_p0  ;;  %s3138_s21 = smov [#allocation5]  }
   0xb   : > { %s5569_s18 = scalar_select %p3220_p4, 1, 0 }
   0xc   : > { %s5570_s19 = scalar_select %p3225_p6, 1, 0 }
   0xd   : > { %p3230_p8 = pnand %p2747_p5, %p119_p7  ;;  %s131_s22 = sshll.u32 %s3138_s21, 4  ;;  %s132_s22 = int_to_ptr.vmem [resolvable:$true] %s131_s22 }
   0xe   : > { %s3244_s24 = sadd.s32 1, %s3136_s15   ;;  %s27_s25 = sadd.s32 1, %s3132_s14 }
   0xf   : > { %s5571_s20 = scalar_select %p3230_p8, 1, 0 }
  0x10   : > { %p2911_p9 = pneg %p3230_p8  ;;  %s24_s26 = ssub.s32 %s3136_s15, %s3244_s24 }
  0x11   : > { %s3025_s27 = scalar_lea.vmem %s132_s22, 640  ;;  %p3033_p5 = scmp.lt.s32.totalorder %s132_s22, %s132_s22 }
  0x12   : > { %p3239_p11 = pnand %p2911_p9, %p5443_p1  ;;  %p3026_p13 = scmp.ne.s32.totalorder %s132_s22, %s3025_s27 }
  0x13   : > { %p3034_p7 = scmp.lt.s32.totalorder %s3025_s27, %s3025_s27 }
  0x14   : > { %p3016_p12 = pneg %p3239_p11 }
  0x15   : > { %p3035_p10 = por %p3034_p7, %p3033_p5 }
  0x16   : > { %p3028_p0 = pnand %p3026_p13, %p3016_p12 }
  0x18   : > { %p3029_p3 = pneg %p3028_p0 }
  0x1a   : > { %p3036_p2 = pnand %p3035_p10, %p3029_p3 }
  0x1c   : > { %3039 = shalt.err (!%p3036_p2)
}
  0x1d   : > { %s3139_s28 = smov 128   ;;  %s3140_s29 = smov 8  }
  0x1e   : > { %2914 = dma.hbm_to_vmem [thread:$0]  (!%p3239_p11), %s5440_s1, 640, %s132_s22, [#allocation6], %s3139_s28, %s3139_s28, %s3140_s29  }
  0x1f   : > { %p25_p2 = scmp.eq.s32.totalorder %s24_s26, 0  ;;  %p34_p9 = scmp.ne.s32.totalorder %s3132_s14, %s3128_s13 }
  0x20   : > { %p35_p10 = scmp.eq.s32.totalorder %s3136_s15, 0  ;;  %p2924_p12 = scmp.lt.s32.totalorder %s3136_s15, 2 }
  0x21   : > { %s3264_s5 = scalar_select %p25_p2, %s3132_s14, %s27_s25  }
  0x22   : > { %p36_p13 = por %p35_p10, %p34_p9  ;;  %p5573_p0 = scmp.eq.s32.totalorder %s3211_s16, 1 }
  0x23   : > { %s148_s7 = sand.u32 1, %s3132_s14   ;;  %s2796_s8 = sshll.u32 %s3136_s15, 8 }
  0x24   : > { %p3268_p3 = por %p5573_p0, %p34_p9  ;;  %s2750_s9 = sshll.u32 %s148_s7, 4 }
  0x25   : > { %s3277_s17 = scalar_lea.hbm %s5439_s0, %s2796_s8  ;;  %s152_s21 = scalar_lea.vmem [#allocation2], %s2750_s9 }
  0x26   : > { %s5574_s6 = scalar_select %p3268_p3, 1, 0 }
  0x27   : > { %s159_s22 = sshll.u32 %s152_s21, 4  ;;  %p3279_p11 = pnand %p2924_p12, %p36_p13  ;;  %s3283_s22 = int_to_ptr.vmem [resolvable:$true] %s159_s22 }
  0x28   : > { %s3285_s25 = scalar_lea.sflag [#allocation3], %s148_s7  ;;  %s3040_s26 = scalar_lea.hbm %s3277_s17, 256 }
  0x29   : > { %p3041_p5 = scmp.ne.s32.totalorder %s3277_s17, %s3040_s26  ;;  %p3042_p7 = pneg %p3279_p11 }
  0x2a   : > { %s3045_s4 = scalar_lea.hbm %s5439_s0, 512  ;;  %p3046_p10 = scmp.lt.s32.totalorder %s3277_s17, %s5439_s0 }
  0x2b   : > { %p3043_p2 = pnand %p3042_p7, %p3041_p5  ;;  %p3047_p12 = scmp.lt.s32.totalorder %s3045_s4, %s3040_s26 }
  0x2d   : > { %p3044_p9 = pneg %p3043_p2  ;;  %p3048_p13 = por %p3047_p12, %p3046_p10 }
  0x2f   : > { %p3049_p0 = pnand %p3048_p13, %p3044_p9 }
  0x31   : > { %3052 = shalt.err (!%p3049_p0)
}
  0x32   : > { %s3053_s7 = scalar_lea.vmem %s3283_s22, 256  ;;  %s3141_s10 = smov [#allocation2]  }
  0x33   : > { %p3054_p1 = scmp.ne.s32.totalorder %s3283_s22, %s3053_s7  ;;  %s3058_s11 = sshll.u32 %s3141_s10, 4  ;;  %s3059_s11 = int_to_ptr.vmem [resolvable:$false] %s3058_s11 }
  0x34   : > { %s3060_s21 = scalar_lea.vmem %s3059_s11, 512  ;;  %p3061_p2 = scmp.lt.s32.totalorder %s3283_s22, %s3059_s11 }
  0x35   : > { %p3056_p6 = pnand %p3054_p1, %p3042_p7  ;;  %p3062_p3 = scmp.lt.s32.totalorder %s3060_s21, %s3053_s7 }
  0x37   : > { %p3057_p5 = pneg %p3056_p6  ;;  %p3063_p4 = por %p3062_p3, %p3061_p2 }
  0x39   : > { %p3064_p8 = pnand %p3063_p4, %p3057_p5 }
  0x3b   : > { %3067 = shalt.err (!%p3064_p8)
}
  0x3c   : > { %2918 = dma.hbm_to_vmem [thread:$0]  (!%p3279_p11), %s3277_s17, 256, %s3283_s22, %s3285_s25, %s3139_s28, %s3139_s28, %s3140_s29  }
  0x3d   : > { %p5576_p1 = scmp.ne.s32.totalorder %s5571_s20, 0 }
  0x3f   : > { %171 = sbr.rel (%p5576_p1) target bundleno = 1088 (0x440), region = 32 }
  0x44   : > { %s3312_s26 = sand.u32 1, %s3128_s13   ;;  %p5577_p4 = scmp.ne.s32.totalorder %s5569_s18, 0 }
  0x45   : > { %s2754_s27 = sshll.u32 %s3312_s26, 4  ;;  %s174_s30 = scalar_lea.sflag [#allocation3], %s3312_s26 }
  0x46   : > { %s177_s4 = scalar_lea.vmem [#allocation2], %s2754_s27 }
  0x47   : > { %3111 = dma.done.wait (%p5577_p4), %s174_s30, 256  }
  0x48   : > { %3113 = vsyncadd (%p5577_p4), %s174_s30, 4294967040  ;;  %p5578_p6 = scmp.eq.s32.totalorder %s3211_s16, 0 }
  0x4a   : > { %3115 = dma.done.wait (%p5578_p6), [#allocation6], 640   ;;  %p5579_p8 = pmov %p5578_p6 }
  0x4b   : > { %v3324_v0 = vld [vmem:[%s177_s4] sm:$0xff]  ;;  %s3142_s20 = smov 120   ;;  %s3143_s28 = smov 124   ;;  %v3328_v1 = vld [vmem:[%s177_s4 + $0x8] sm:$0xff]  ;;  %v3155_v2 = vmov 0.0   ;;  %vm875_vm0 = vcmask 1040384   ;;  %v303_v36 = vlaneseq }
  0x4c   : > { %3117 = vsyncadd (%p5579_p8), [#allocation6], 4294966656  ;;  %214 = vrot.lane.b32.xlu1 %v3324_v0, %s3142_s20  ;;  %208 = vrot.lane.b32.xlu0 %v3324_v0, %s3143_s28  ;;  %s3144_s18 = smov 116   ;;  %s3145_s29 = smov 112   ;;  %v3354_v3 = vrot.slane %v3155_v2, 7  ;;  %vm1218_vm1 = vcmask 1045504  }
  0x4d   : > { %s3146_s17 = smov 108   ;;  %s3147_s22 = smov 104   ;;  %vm1041_vm2 = vcmask 1046528   ;;  %v3160_v34 = vmov 1983009808   ;;  %v304_v40 = vshrl.u32 %v303_v36, 7 }
  0x4e   : > { %s3148_s23 = smov 100   ;;  %s3149_s25 = smov 96   ;;  %5580 = vst [vmem:[#allocation11_spill] sm:$0xff] %v3354_v3  ;;  %v3360_v4 = vsel %vm875_vm0, 0.0, %v3354_v3  ;;  %v992_v5 = vsel %vm875_vm0, %v3354_v3, 0.0  ;;  %v1220_v6 = vrot.slane %v3354_v3, 2  ;;  %v301_v35 = vunpack.c.l.s4 %v3160_v34 }
  0x4f   : > { %s3150_s8 = smov 92   ;;  %s3151_s9 = smov 88   ;;  %5581 = vst [vmem:[#allocation12_spill] sm:$0xff] %v3360_v4  ;;  %v1043_v7 = vrot.slane %v3354_v3, 1  ;;  %v1219_v8 = vrot.slane %v3360_v4, 2  ;;  %v1222_v9 = vrot.slane %v992_v5, 2 }
  0x50   : > { %216 = vrot.lane.b32.xlu1 %v3328_v1, %s3142_s20  ;;  %210 = vrot.lane.b32.xlu0 %v3328_v1, %s3143_s28  ;;  %s3152_s7 = smov 84   ;;  %s3153_s10 = smov 80   ;;  %v1042_v10 = vrot.slane %v3360_v4, 1  ;;  %v1045_v11 = vrot.slane %v992_v5, 1  ;;  %v302_v39 = vunpack.c.0.s8 %v301_v35  ;;  %v3161_v42 = vmov 1934713408  }
  0x51   : > { %s3154_s11 = smov 76   ;;  %s3156_s21 = smov 72   ;;  %v1221_v12 = vsel %vm1218_vm1, %v1219_v8, %v1220_v6  ;;  %v1223_v13 = vsel %vm1218_vm1, %v1220_v6, %v1222_v9  ;;  %v365_v43 = vunpack.c.l.s4 %v3161_v42  ;;  %vm2356_vm3 = vcmask 1043456  }
  0x52   : > { %s3157_s27 = smov 68   ;;  %v1044_v14 = vsel %vm1041_vm2, %v1042_v10, %v1043_v7  ;;  %v3373_v15 = vpack.i.bf16 %v1223_v13, %v1221_v12  ;;  %v1046_v16 = vsel %vm1041_vm2, %v1043_v7, %v1045_v11  ;;  %s3158_s30 = smov 8   ;;  %v3408_v45 = vsub.s32 %v302_v39, %v304_v40 }
  0x53   : > { %v3376_v17 = vpack.i.bf16 %v1046_v16, %v1044_v14  ;;  %s3159_s4 = smov 4   ;;  %v366_v52 = vunpack.c.0.s8 %v365_v43  ;;  %s3162_s20 = smov 12   ;;  %vm1983_vm4 = vcmask 31744   ;;  %vm2016_vm5 = vcmask 64512  }
  0x54   : > { %222 = vrot.lane.b32.xlu1 %v3328_v1, %s3144_s18  ;;  %220 = vrot.lane.b32.xlu0 %v3324_v0, %s3144_s18  ;;  %5582 = vst [vmem:[#allocation13_spill] sm:$0xff] %v3373_v15  ;;  %s3163_s28 = smov 16   ;;  %s3164_s18 = smov 20   ;;  %vm2049_vm6 = vcmask 97280   ;;  %vm2082_vm7 = vcmask 130048   ;;  %vm2115_vm8 = vcmask 162816  }
  0x55   : > { %5583 = vst [vmem:[#allocation14_spill] sm:$0xff] %v3376_v17  ;;  %v3433_v6 = vsub.s32 %v366_v52, %v304_v40  ;;  %vm2148_vm9 = vcmask 195584   ;;  %vm2181_vm10 = vcmask 228352   ;;  %vm2214_vm11 = vcmask 261120   ;;  %p5896_p11 = scmp.ne.s32.totalorder %s5574_s6, 0 }
  0x56   : > { %vm2259_vm12 = vcmask 293888  }
  0x58   : > { %228 = vrot.lane.b32.xlu1 %v3328_v1, %s3145_s29  ;;  %226 = vrot.lane.b32.xlu0 %v3324_v0, %s3145_s29  ;;  %s3165_s29 = smov 24  }
  0x5c   : > { %234 = vrot.lane.b32.xlu1 %v3328_v1, %s3146_s17  ;;  %232 = vrot.lane.b32.xlu0 %v3324_v0, %s3146_s17  ;;  %s3166_s17 = smov 28  }
  0x60   : > { %240 = vrot.lane.b32.xlu1 %v3328_v1, %s3147_s22  ;;  %238 = vrot.lane.b32.xlu0 %v3324_v0, %s3147_s22  ;;  %s3167_s22 = smov 32  }
  0x64   : > { %246 = vrot.lane.b32.xlu1 %v3328_v1, %s3148_s23  ;;  %244 = vrot.lane.b32.xlu0 %v3324_v0, %s3148_s23 }
  0x68   : > { %252 = vrot.lane.b32.xlu1 %v3328_v1, %s3149_s25  ;;  %250 = vrot.lane.b32.xlu0 %v3324_v0, %s3149_s25 }
  0x6c   : > { %258 = vrot.lane.b32.xlu1 %v3328_v1, %s3150_s8  ;;  %256 = vrot.lane.b32.xlu0 %v3324_v0, %s3150_s8  ;;  %s2756_s8 = sshll.u32 %s3312_s26, 8 }
  0x70   : > { %264 = vrot.lane.b32.xlu1 %v3328_v1, %s3151_s9  ;;  %262 = vrot.lane.b32.xlu0 %v3324_v0, %s3151_s9  ;;  %s5204_s9 = scalar_lea.vmem [#allocation7], %s2756_s8 }
  0x74   : > { %270 = vrot.lane.b32.xlu1 %v3328_v1, %s3152_s7  ;;  %268 = vrot.lane.b32.xlu0 %v3324_v0, %s3152_s7  ;;  %s2797_s7 = sshll.u32 %s3211_s16, 12  ;;  %s2650_s16 = scalar_lea.sflag [#allocation4], %s3312_s26 }
  0x78   : > { %276 = vrot.lane.b32.xlu1 %v3328_v1, %s3153_s10  ;;  %274 = vrot.lane.b32.xlu0 %v3324_v0, %s3153_s10  ;;  %s2663_s10 = sshll.u32 %s5204_s9, 4  ;;  %s5393_s10 = int_to_ptr.vmem [resolvable:$true] %s2663_s10 }
  0x7c   : > { %282 = vrot.lane.b32.xlu1 %v3328_v1, %s3154_s11  ;;  %280 = vrot.lane.b32.xlu0 %v3324_v0, %s3154_s11 }
  0x80   : > { %288 = vrot.lane.b32.xlu1 %v3328_v1, %s3156_s21  ;;  %286 = vrot.lane.b32.xlu0 %v3324_v0, %s3156_s21 }
  0x84   : > { %294 = vrot.lane.b32.xlu1 %v3328_v1, %s3157_s27  ;;  %292 = vrot.lane.b32.xlu0 %v3324_v0, %s3157_s27  ;;  %s5390_s27 = scalar_lea.hbm %s5442_s3, %s2797_s7 }
  0x88   : > { %2995 = vrot.lane.b32.xlu1 %v3373_v15, %s3158_s30  ;;  %2990 = vrot.lane.b32.xlu0 %v3376_v17, %s3159_s4 }
  0xbe   : > { %v215_v18 = vpop.permute.xlu1 %214  ;;  %v209_v19 = vpop.permute.xlu0 %208 }
  0xbf   : > { %v298_v49 = vcombine.low %v3324_v0, %v215_v18  ;;  %v299_v51 = vcombine.high %v3324_v0, %v215_v18 }
  0xc1   : > { %v306_v62 = vrot.slane %v298_v49, %v3408_v45  ;;  %v313_v0 = vrot.slane %v299_v51, %v3408_v45 }
  0xc2   : > { %v217_v20 = vpop.permute.xlu1 %216  ;;  %v211_v21 = vpop.permute.xlu0 %210 }
  0xc3   : > { %v570_v46 = vcombine.low %v3328_v1, %v217_v20  ;;  %v571_v55 = vcombine.high %v3328_v1, %v217_v20 }
  0xc5   : > { %v578_v56 = vrot.slane %v570_v46, %v3408_v45  ;;  %v3431_v5 = vrot.slane %v571_v55, %v3408_v45 }
  0xc6   : > { %v223_v22 = vpop.permute.xlu1 %222  ;;  %v221_v23 = vpop.permute.xlu0 %220 }
  0xc7   : > { %v586_v47 = vcombine.low %v211_v21, %v223_v22  ;;  %v314_v50 = vcombine.low %v209_v19, %v221_v23  ;;  %v315_v53 = vcombine.high %v209_v19, %v221_v23  ;;  %v587_v57 = vcombine.high %v211_v21, %v223_v22 }
  0xc9   : > { %v594_v58 = vrot.slane %v586_v47, %v3408_v45  ;;  %v322_v63 = vrot.slane %v314_v50, %v3408_v45  ;;  %v329_v1 = vrot.slane %v315_v53, %v3408_v45  ;;  %v3436_v7 = vrot.slane %v587_v57, %v3408_v45 }
  0xca   : > { %v3382_v24 = vpop.permute.xlu1 %228  ;;  %v3384_v25 = vpop.permute.xlu0 %226 }
  0xcb   : > { %v634_v8 = vcombine.low %v578_v56, %v594_v58  ;;  %v635_v14 = vcombine.high %v578_v56, %v594_v58  ;;  %v362_v16 = vcombine.low %v306_v62, %v322_v63  ;;  %v363_v18 = vcombine.high %v306_v62, %v322_v63 }
  0xcc   : > { %v378_v19 = vcombine.low %v313_v0, %v329_v1  ;;  %v379_v34 = vcombine.high %v313_v0, %v329_v1 }
  0xcd   : > { %v3455_v36 = vrot.slane %v634_v8, %v3433_v6  ;;  %v3465_v40 = vrot.slane %v635_v14, %v3433_v6  ;;  %v377_v43 = vrot.slane %v363_v18, %v3433_v6 }
  0xce   : > { %v3386_v26 = vpop.permute.xlu1 %234  ;;  %v3388_v27 = vpop.permute.xlu0 %232  ;;  %v3472_v46 = vrot.slane %v378_v19, %v3433_v6  ;;  %v3477_v50 = vrot.slane %v379_v34, %v3433_v6 }
  0xd2   : > { %v3390_v28 = vpop.permute.xlu1 %240  ;;  %v3392_v29 = vpop.permute.xlu0 %238 }
  0xd3   : > { %v330_v60 = vcombine.low %v3384_v25, %v3392_v29  ;;  %v602_v10 = vcombine.low %v3382_v24, %v3390_v28  ;;  %v331_v20 = vcombine.high %v3384_v25, %v3392_v29  ;;  %v603_v35 = vcombine.high %v3382_v24, %v3390_v28 }
  0xd4   : > { %v370_v24 = vrot.slane %v362_v16, %v3433_v6 }
  0xd5   : > { %v338_v11 = vrot.slane %v330_v60, %v3408_v45  ;;  %v3458_v39 = vrot.slane %v602_v10, %v3408_v45  ;;  %v345_v47 = vrot.slane %v331_v20, %v3408_v45  ;;  %v3480_v51 = vrot.slane %v603_v35, %v3408_v45 }
  0xd6   : > { %v3394_v30 = vpop.permute.xlu1 %246  ;;  %v245_v31 = vpop.permute.xlu0 %244 }
  0xd7   : > { %v346_v54 = vcombine.low %v3388_v27, %v245_v31  ;;  %v618_v12 = vcombine.low %v3386_v26, %v3394_v30  ;;  %v347_v13 = vcombine.high %v3388_v27, %v245_v31 }
  0xd9   : > { %v354_v2 = vrot.slane %v346_v54, %v3408_v45  ;;  %v3461_v25 = vrot.slane %v618_v12, %v3408_v45  ;;  %v361_v29 = vrot.slane %v347_v13, %v3408_v45 }
  0xda   : > { %v3396_v32 = vpop.permute.xlu1 %252  ;;  %v3398_v33 = vpop.permute.xlu0 %250 }
  0xdb   : > { %v394_v21 = vcombine.low %v338_v11, %v354_v2  ;;  %v395_v28 = vcombine.high %v338_v11, %v354_v2  ;;  %v666_v55 = vcombine.low %v3458_v39, %v3461_v25  ;;  %v410_v56 = vcombine.low %v345_v47, %v361_v29 }
  0xdc   : > { %v411_v12 = vcombine.high %v345_v47, %v361_v29 }
  0xdd   : > { %v402_v49 = vrot.slane %v394_v21, %v3433_v6  ;;  %v409_v0 = vrot.slane %v395_v28, %v3433_v6  ;;  %v3500_v16 = vrot.slane %v666_v55, %v3433_v6  ;;  %v3503_v18 = vrot.slane %v410_v56, %v3433_v6 }
  0xde   : > { %v3400_v37 = vpop.permute.xlu0 %256  ;;  %v3402_v38 = vpop.permute.xlu1 %258 }
  0xdf   : > { %v426_v2 = vcombine.low %v370_v24, %v402_v49  ;;  %v427_v19 = vcombine.high %v370_v24, %v402_v49  ;;  %v429_v34 = vcombine.high %v377_v43, %v409_v0 }
  0xe1   : > { %v878_v35 = vrot.slane %v426_v2, 7  ;;  %v881_v56 = vrot.slane %v427_v19, 7 }
  0xe2   : > { %v3404_v41 = vpop.permute.xlu0 %262  ;;  %v3406_v44 = vpop.permute.xlu1 %264 }
  0xe3   : > { %v434_v42 = vcombine.low %v3398_v33, %v3404_v41 }
  0xe5   : > { %v442_v1 = vrot.slane %v434_v42, %v3408_v45 }
  0xe6   : > { %v3411_v48 = vpop.permute.xlu0 %268  ;;  %v3423_v61 = vpop.permute.xlu1 %270 }
  0xe7   : > { %v450_v27 = vcombine.low %v3400_v37, %v3411_v48  ;;  %v451_v8 = vcombine.high %v3400_v37, %v3411_v48  ;;  %v428_v37 = vcombine.low %v377_v43, %v409_v0  ;;  %v435_v48 = vcombine.high %v3398_v33, %v3404_v41 }
  0xe8   : > { %v3521_v33 = vrot.slane %v411_v12, %v3433_v6  ;;  %v430_v41 = vcombine.low %v3472_v46, %v3503_v18  ;;  %v706_v0 = vcombine.low %v3396_v32, %v3406_v44 }
  0xe9   : > { %v458_v52 = vrot.slane %v450_v27, %v3408_v45  ;;  %v3511_v27 = vrot.slane %v451_v8, %v3408_v45  ;;  %v3536_v8 = vsel %vm875_vm0, 0.0, %v878_v35 }
  0xea   : > { %v3419_v59 = vpop.permute.xlu0 %274  ;;  %v3446_v22 = vpop.permute.xlu1 %276 }
  0xeb   : > { %v499_v13 = vcombine.high %v442_v1, %v458_v52 }
  0xed   : > { %v513_v28 = vrot.slane %v499_v13, %v3433_v6 }
  0xee   : > { %v281_v9 = vpop.permute.xlu0 %280  ;;  %v3486_v57 = vpop.permute.xlu1 %282 }
  0xf2   : > { %v287_v31 = vpop.permute.xlu0 %286 }
  0xf3   : > { %v466_v53 = vcombine.low %v3419_v59, %v287_v31  ;;  %v467_v10 = vcombine.high %v3419_v59, %v287_v31  ;;  %v3513_v31 = vpop.permute.xlu1 %288 }
  0xf5   : > { %v474_v14 = vrot.slane %v466_v53, %v3408_v45  ;;  %v481_v29 = vrot.slane %v467_v10, %v3408_v45 }
  0xf6   : > { %v293_v54 = vpop.permute.xlu0 %292 }
  0xf7   : > { %v482_v58 = vcombine.low %v281_v9, %v293_v54  ;;  %v483_v60 = vcombine.high %v281_v9, %v293_v54  ;;  %v498_v9 = vcombine.low %v442_v1, %v458_v52  ;;  %v3529_v52 = vrot.slane %v435_v48, %v3408_v45  ;;  %v3540_v12 = vpop.permute.xlu1 %294 }
  0xf9   : > { %v490_v11 = vrot.slane %v482_v58, %v3408_v45  ;;  %v3506_v20 = vrot.slane %v483_v60, %v3408_v45  ;;  %v506_v24 = vrot.slane %v498_v9, %v3433_v6  ;;  %v884_v58 = vrot.slane %v428_v37, 7 }
  0xfa   : > { %v887_v60 = vrot.slane %v429_v34, 7  ;;  %v514_v1 = vcombine.low %v3529_v52, %v3511_v27 }
  0xfb   : > { %v530_v59 = vcombine.low %v474_v14, %v490_v11  ;;  %v531_v21 = vcombine.high %v474_v14, %v490_v11  ;;  %v546_v49 = vcombine.low %v481_v29, %v3506_v20  ;;  %v722_v11 = vcombine.low %v3402_v38, %v3423_v61 }
  0xfd   : > { %v538_v42 = vrot.slane %v530_v59, %v3433_v6  ;;  %v545_v47 = vrot.slane %v531_v21, %v3433_v6  ;;  %v554_v9 = vrot.slane %v546_v49, %v3433_v6  ;;  %v547_v49 = vcombine.high %v481_v29, %v3506_v20 }
  0xff   : > { %v562_v53 = vcombine.low %v506_v24, %v538_v42  ;;  %v563_v54 = vcombine.high %v506_v24, %v538_v42  ;;  %v564_v55 = vcombine.low %v513_v28, %v545_v47  ;;  %v565_v14 = vcombine.high %v513_v28, %v545_v47 }
 0x100   : > { %v1047_v24 = vrot.slane %v3536_v8, 1  ;;  %v3559_v28 = vsel %vm875_vm0, 0.0, %v881_v56  ;;  %v738_v42 = vcombine.low %v3446_v22, %v3513_v31  ;;  %v754_v47 = vcombine.low %v3486_v57, %v3540_v12 }
 0x101   : > { %v879_v2 = vrot.slane %v562_v53, 7  ;;  %v882_v10 = vrot.slane %v563_v54, 7  ;;  %v885_v13 = vrot.slane %v564_v55, 7  ;;  %v888_v29 = vrot.slane %v565_v14, 7 }
 0x102   : > { %v3595_v23 = vrot.slane %v738_v42, %v3408_v45  ;;  %v3598_v63 = vrot.slane %v754_v47, %v3408_v45 }
 0x103   : > { %v3544_v19 = vsel %vm875_vm0, %v878_v35, %v879_v2  ;;  %v3547_v37 = vsel %vm875_vm0, %v879_v2, 0.0  ;;  %v3550_v48 = vsel %vm875_vm0, %v881_v56, %v882_v10  ;;  %v3553_v59 = vsel %vm875_vm0, %v882_v10, 0.0 }
 0x104   : > { %5584 = vst [vmem:[#allocation15_spill] sm:$0xff] %v3544_v19  ;;  %v1048_v21 = vrot.slane %v3544_v19, 1  ;;  %v1050_v34 = vrot.slane %v3547_v37, 1  ;;  %v522_v35 = vrot.slane %v514_v1, %v3433_v6  ;;  %v1053_v55 = vrot.slane %v3550_v48, 1 }
 0x105   : > { %v1055_v56 = vrot.slane %v3553_v59, 1  ;;  %v3580_v1 = vsel %vm875_vm0, %v884_v58, %v885_v13  ;;  %v3583_v20 = vsel %vm875_vm0, %v885_v13, 0.0  ;;  %v3586_v10 = vrot.slane %v706_v0, %v3408_v45 }
 0x106   : > { %v3568_v53 = vsel %vm1041_vm2, %v1048_v21, %v1050_v34  ;;  %v3571_v54 = vsel %vm1041_vm2, %v1047_v24, %v1048_v21  ;;  %5585 = vst [vmem:[#allocation16_spill] sm:$0xff] %v3580_v1  ;;  %v566_v2 = vcombine.low %v522_v35, %v554_v9  ;;  %v3589_v21 = vrot.slane %v722_v11, %v3408_v45 }
 0x107   : > { %1128 = vrot.lane.b32.xlu0 %v3568_v53, %s3159_s4  ;;  %1126 = vrot.lane.b32.xlu1 %v3571_v54, %s3159_s4  ;;  %v515_v34 = vcombine.high %v3529_v52, %v3511_v27  ;;  %v1052_v24 = vrot.slane %v3559_v28, 1  ;;  %v3601_v13 = vrot.slane %v547_v49, %v3433_v6  ;;  %v3604_v0 = vsel %vm875_vm0, 0.0, %v884_v58 }
 0x108   : > { %5586 = vst [vmem:[#allocation17_spill] sm:$0xff] %v3604_v0  ;;  %v3607_v11 = vsel %vm1041_vm2, %v1053_v55, %v1055_v56  ;;  %v1058_v27 = vrot.slane %v3580_v1, 1  ;;  %v1060_v52 = vrot.slane %v3583_v20, 1  ;;  %v3619_v42 = vsel %vm875_vm0, %v887_v60, %v888_v29 }
 0x109   : > { %5587 = vst [vmem:[#allocation18_spill] sm:$0xff] %v3607_v11  ;;  %v3610_v14 = vsel %vm1041_vm2, %v1052_v24, %v1053_v55  ;;  %5589 = vst [vmem:[#allocation20_spill] sm:$0xff] %v3619_v42  ;;  %v3622_v58 = vsel %vm875_vm0, %v888_v29, 0.0  ;;  %v891_v47 = vrot.slane %v566_v2, 7  ;;  %v567_v49 = vcombine.high %v522_v35, %v554_v9 }
 0x10a   : > { %5588 = vst [vmem:[#allocation19_spill] sm:$0xff] %v3610_v14  ;;  %v432_v55 = vcombine.low %v3477_v50, %v3521_v33  ;;  %v433_v56 = vcombine.high %v3477_v50, %v3521_v33  ;;  %v890_v24 = vrot.slane %v430_v41, 7  ;;  %v1057_v62 = vrot.slane %v3604_v0, 1 }
 0x10b   : > { %1132 = vrot.lane.b32.xlu0 %v3607_v11, %s3159_s4  ;;  %1130 = vrot.lane.b32.xlu1 %v3610_v14, %s3159_s4  ;;  %v770_v43 = vcombine.low %v3586_v10, %v3589_v21  ;;  %v529_v15 = vrot.slane %v515_v34, %v3433_v6  ;;  %v802_v29 = vcombine.low %v3595_v23, %v3598_v63  ;;  %v3635_v2 = vsel %vm875_vm0, 0.0, %v887_v60 }
 0x10c   : > { %5590 = vst [vmem:[#allocation21_spill] sm:$0xff] %v3635_v2  ;;  %v3638_v9 = vsel %vm1041_vm2, %v1058_v27, %v1060_v52  ;;  %v3641_v35 = vsel %vm1041_vm2, %v1057_v62, %v1058_v27  ;;  %v1063_v50 = vrot.slane %v3619_v42, 1  ;;  %v1065_v33 = vrot.slane %v3622_v58, 1 }
 0x10d   : > { %5591 = vst [vmem:[#allocation22_spill] sm:$0xff] %v3638_v9  ;;  %5592 = vst [vmem:[#allocation23_spill] sm:$0xff] %v3641_v35  ;;  %v3650_v41 = vsel %vm875_vm0, %v890_v24, %v891_v47  ;;  %v3653_v60 = vsel %vm875_vm0, %v891_v47, 0.0  ;;  %v894_v34 = vrot.slane %v567_v49, 7  ;;  %v568_v62 = vcombine.low %v529_v15, %v3601_v13 }
 0x10e   : > { %5593 = vst [vmem:[#allocation24_spill] sm:$0xff] %v3650_v41  ;;  %v698_v27 = vcombine.low %v3455_v36, %v3500_v16  ;;  %v5594_v52 = vcombine.high %v3472_v46, %v3503_v18  ;;  %v896_v3 = vrot.slane %v432_v55, 7  ;;  %v1062_v4 = vrot.slane %v3635_v2, 1 }
 0x10f   : > { %1136 = vrot.lane.b32.xlu0 %v3638_v9, %s3159_s4  ;;  %1134 = vrot.lane.b32.xlu1 %v3641_v35, %s3159_s4  ;;  %v899_v35 = vrot.slane %v433_v56, 7  ;;  %v3663_v9 = vrot.slane %v770_v43, %v3433_v6  ;;  %v3666_v47 = vrot.slane %v802_v29, %v3433_v6  ;;  %v3669_v49 = vsel %vm875_vm0, 0.0, %v890_v24 }
 0x110   : > { %v893_v17 = vrot.slane %v5594_v52, 7  ;;  %5595 = vst [vmem:[#allocation25_spill] sm:$0xff] %v3669_v49  ;;  %v3672_v11 = vsel %vm1041_vm2, %v1063_v50, %v1065_v33  ;;  %v3675_v14 = vsel %vm1041_vm2, %v1062_v4, %v1063_v50  ;;  %v1068_v46 = vrot.slane %v3650_v41, 1 }
 0x111   : > { %v1070_v18 = vrot.slane %v3653_v60, 1  ;;  %v3687_v55 = vsel %vm875_vm0, %v894_v34, 0.0  ;;  %v897_v56 = vrot.slane %v568_v62, 7  ;;  %v569_v4 = vcombine.high %v529_v15, %v3601_v13 }
 0x112   : > { %v3684_v43 = vsel %vm875_vm0, %v893_v17, %v894_v34  ;;  %v707_v24 = vcombine.high %v3396_v32, %v3406_v44  ;;  %v723_v29 = vcombine.high %v3402_v38, %v3423_v61  ;;  %v771_v50 = vcombine.high %v3586_v10, %v3589_v21 }
 0x113   : > { %1140 = vrot.lane.b32.xlu0 %v3672_v11, %s3159_s4  ;;  %1138 = vrot.lane.b32.xlu1 %v3675_v14, %s3159_s4  ;;  %v1067_v33 = vrot.slane %v3669_v49, 1  ;;  %v739_v52 = vcombine.high %v3446_v22, %v3513_v31  ;;  %v755_v34 = vcombine.high %v3486_v57, %v3540_v12  ;;  %v803_v15 = vcombine.high %v3595_v23, %v3598_v63 }
 0x114   : > { %v3704_v13 = vsel %vm875_vm0, 0.0, %v893_v17  ;;  %v3707_v32 = vsel %vm1041_vm2, %v1068_v46, %v1070_v18  ;;  %v1073_v44 = vrot.slane %v3684_v43, 1  ;;  %v1075_v61 = vrot.slane %v3687_v55, 1 }
 0x115   : > { %v3710_v38 = vsel %vm1041_vm2, %v1067_v33, %v1068_v46  ;;  %v3719_v22 = vsel %vm875_vm0, %v896_v3, %v897_v56  ;;  %v3722_v17 = vsel %vm875_vm0, %v897_v56, 0.0  ;;  %v900_v23 = vrot.slane %v569_v4, 7 }
 0x116   : > { %5596 = vst [vmem:[#allocation26_spill] sm:$0xff] %v3710_v38  ;;  %5597 = vst [vmem:[#allocation27_spill] sm:$0xff] %v3719_v22  ;;  %v834_v57 = vcombine.low %v3663_v9, %v3666_v47  ;;  %v3727_v63 = vrot.slane %v707_v24, %v3408_v45  ;;  %v3730_v31 = vrot.slane %v723_v29, %v3408_v45  ;;  %v1072_v10 = vrot.slane %v3704_v13, 1 }
 0x117   : > { %1144 = vrot.lane.b32.xlu0 %v3707_v32, %s3159_s4  ;;  %1142 = vrot.lane.b32.xlu1 %v3710_v38, %s3159_s4  ;;  %v785_v12 = vrot.slane %v771_v50, %v3433_v6  ;;  %v3735_v21 = vrot.slane %v739_v52, %v3408_v45  ;;  %v3738_v62 = vrot.slane %v755_v34, %v3408_v45  ;;  %v3742_v18 = vsel %vm875_vm0, 0.0, %v896_v3 }
 0x118   : > { %v817_v46 = vrot.slane %v803_v15, %v3433_v6  ;;  %5598 = vst [vmem:[#allocation28_spill] sm:$0xff] %v3742_v18  ;;  %v3745_v56 = vsel %vm1041_vm2, %v1073_v44, %v1075_v61  ;;  %v3748_v4 = vsel %vm1041_vm2, %v1072_v10, %v1073_v44  ;;  %v1078_v24 = vrot.slane %v3719_v22, 1 }
 0x119   : > { %5599 = vst [vmem:[#allocation29_spill] sm:$0xff] %v3745_v56  ;;  %5600 = vst [vmem:[#allocation30_spill] sm:$0xff] %v3748_v4  ;;  %v1080_v29 = vrot.slane %v3722_v17, 1  ;;  %v3757_v50 = vsel %vm875_vm0, %v899_v35, %v900_v23  ;;  %v3760_v3 = vsel %vm875_vm0, %v900_v23, 0.0  ;;  %v903_v33 = vrot.slane %v834_v57, 7 }
 0x11a   : > { %v835_v52 = vcombine.high %v3663_v9, %v3666_v47  ;;  %v5601_v34 = vcombine.high %v3386_v26, %v3394_v30  ;;  %v5602_v44 = vcombine.high %v3458_v39, %v3461_v25  ;;  %v699_v10 = vcombine.high %v3455_v36, %v3500_v16 }
 0x11b   : > { %1148 = vrot.lane.b32.xlu0 %v3745_v56, %s3159_s4  ;;  %1146 = vrot.lane.b32.xlu1 %v3748_v4, %s3159_s4  ;;  %v1077_v23 = vrot.slane %v3742_v18, 1  ;;  %v902_v57 = vrot.slane %v698_v27, 7  ;;  %v786_v9 = vcombine.low %v3727_v63, %v3730_v31  ;;  %v818_v47 = vcombine.low %v3735_v21, %v3738_v62 }
 0x11c   : > { %v3768_v15 = vrot.slane %v5601_v34, %v3408_v45  ;;  %v681_v61 = vrot.slane %v5602_v44, %v3433_v6  ;;  %v3782_v26 = vsel %vm875_vm0, 0.0, %v899_v35  ;;  %v3785_v30 = vsel %vm1041_vm2, %v1078_v24, %v1080_v29 }
 0x11d   : > { %5603 = vst [vmem:[#allocation31_spill] sm:$0xff] %v3782_v26  ;;  %5604 = vst [vmem:[#allocation32_spill] sm:$0xff] %v3785_v30  ;;  %v3788_v45 = vsel %vm1041_vm2, %v1077_v23, %v1078_v24  ;;  %v1083_v36 = vrot.slane %v3757_v50, 1  ;;  %v1085_v39 = vrot.slane %v3760_v3, 1  ;;  %v3797_v25 = vsel %vm875_vm0, %v902_v57, %v903_v33 }
 0x11e   : > { %5605 = vst [vmem:[#allocation33_spill] sm:$0xff] %v3788_v45  ;;  %5606 = vst [vmem:[#allocation34_spill] sm:$0xff] %v3797_v25  ;;  %v3800_v16 = vsel %vm875_vm0, %v903_v33, 0.0  ;;  %v906_v35 = vrot.slane %v835_v52, 7  ;;  %v836_v27 = vcombine.low %v785_v12, %v817_v46  ;;  %v682_v24 = vcombine.low %v3480_v51, %v3768_v15 }
 0x11f   : > { %1152 = vrot.lane.b32.xlu0 %v3785_v30, %s3159_s4  ;;  %1150 = vrot.lane.b32.xlu1 %v3788_v45, %s3159_s4  ;;  %v700_v29 = vcombine.low %v3465_v40, %v681_v61  ;;  %v701_v34 = vcombine.high %v3465_v40, %v681_v61  ;;  %v1082_v44 = vrot.slane %v3782_v26, 1  ;;  %v905_v23 = vrot.slane %v699_v10, 7 }
 0x120   : > { %v3808_v45 = vrot.slane %v786_v9, %v3433_v6  ;;  %v3811_v30 = vsel %vm875_vm0, 0.0, %v902_v57  ;;  %v837_v33 = vcombine.high %v785_v12, %v817_v46  ;;  %v3814_v52 = vsel %vm1041_vm2, %v1083_v36, %v1085_v39 }
 0x121   : > { %5607 = vst [vmem:[#allocation35_spill] sm:$0xff] %v3814_v52  ;;  %v3817_v4 = vsel %vm1041_vm2, %v1082_v44, %v1083_v36  ;;  %v1088_v56 = vrot.slane %v3797_v25, 1  ;;  %v1090_v40 = vrot.slane %v3800_v16, 1  ;;  %v826_v61 = vrot.slane %v818_v47, %v3433_v6 }
 0x122   : > { %5608 = vst [vmem:[#allocation36_spill] sm:$0xff] %v3817_v4  ;;  %v3827_v12 = vsel %vm875_vm0, %v905_v23, %v906_v35  ;;  %v3830_v46 = vsel %vm875_vm0, %v906_v35, 0.0  ;;  %v909_v10 = vrot.slane %v836_v27, 7  ;;  %v5609_v57 = vcombine.low %v3431_v5, %v3436_v7 }
 0x123   : > { %1156 = vrot.lane.b32.xlu0 %v3814_v52, %s3159_s4  ;;  %1154 = vrot.lane.b32.xlu1 %v3817_v4, %s3159_s4  ;;  %v690_v47 = vrot.slane %v682_v24, %v3433_v6  ;;  %v908_v36 = vrot.slane %v700_v29, 7  ;;  %v1087_v39 = vrot.slane %v3811_v30, 1  ;;  %v787_v44 = vcombine.high %v3727_v63, %v3730_v31 }
 0x124   : > { %v658_v9 = vrot.slane %v5609_v57, %v3433_v6  ;;  %v819_v52 = vcombine.high %v3735_v21, %v3738_v62  ;;  %v3843_v35 = vsel %vm875_vm0, 0.0, %v905_v23  ;;  %v912_v27 = vrot.slane %v837_v33, 7 }
 0x125   : > { %v3846_v4 = vsel %vm1041_vm2, %v1088_v56, %v1090_v40  ;;  %v3849_v57 = vsel %vm1041_vm2, %v1087_v39, %v1088_v56  ;;  %v1093_v24 = vrot.slane %v3827_v12, 1  ;;  %v1095_v29 = vrot.slane %v3830_v46, 1 }
 0x126   : > { %5610 = vst [vmem:[#allocation37_spill] sm:$0xff] %v3846_v4  ;;  %5611 = vst [vmem:[#allocation38_spill] sm:$0xff] %v3849_v57  ;;  %v911_v38 = vrot.slane %v701_v34, 7  ;;  %v3858_v63 = vsel %vm875_vm0, %v908_v36, %v909_v10  ;;  %v3861_v31 = vsel %vm875_vm0, %v909_v10, 0.0  ;;  %v838_v21 = vcombine.low %v3808_v45, %v826_v61 }
 0x127   : > { %1160 = vrot.lane.b32.xlu0 %v3846_v4, %s3159_s4  ;;  %1158 = vrot.lane.b32.xlu1 %v3849_v57, %s3159_s4  ;;  %5612 = vst [vmem:[#allocation39_spill] sm:$0xff] %v3858_v63  ;;  %v651_v62 = vcombine.high %v3431_v5, %v3436_v7  ;;  %v683_v56 = vcombine.high %v3480_v51, %v3768_v15  ;;  %v1092_v23 = vrot.slane %v3843_v35, 1  ;;  %v3876_v10 = vsel %vm875_vm0, 0.0, %v908_v36 }
 0x128   : > { %v702_v34 = vcombine.low %v658_v9, %v690_v47  ;;  %v3870_v33 = vrot.slane %v787_v44, %v3433_v6  ;;  %v3873_v40 = vrot.slane %v819_v52, %v3433_v6  ;;  %5613 = vst [vmem:[#allocation40_spill] sm:$0xff] %v3876_v10  ;;  %v3879_v39 = vsel %vm875_vm0, %v911_v38, %v912_v27 }
 0x129   : > { %5614 = vst [vmem:[#allocation41_spill] sm:$0xff] %v3879_v39  ;;  %v3882_v5 = vsel %vm1041_vm2, %v1093_v24, %v1095_v29  ;;  %v3885_v7 = vsel %vm1041_vm2, %v1092_v23, %v1093_v24  ;;  %v1098_v51 = vrot.slane %v3858_v63, 1  ;;  %v1100_v15 = vrot.slane %v3861_v31, 1 }
 0x12a   : > { %5615 = vst [vmem:[#allocation42_spill] sm:$0xff] %v3882_v5  ;;  %5616 = vst [vmem:[#allocation43_spill] sm:$0xff] %v3885_v7  ;;  %v3894_v52 = vsel %vm875_vm0, %v912_v27, 0.0  ;;  %v915_v36 = vrot.slane %v838_v21, 7  ;;  %v839_v44 = vcombine.high %v3808_v45, %v826_v61  ;;  %v3898_v29 = vrot.slane %v651_v62, %v3433_v6 }
 0x12b   : > { %1164 = vrot.lane.b32.xlu0 %v3882_v5, %s3159_s4  ;;  %1162 = vrot.lane.b32.xlu1 %v3885_v7, %s3159_s4  ;;  %v3901_v24 = vrot.slane %v683_v56, %v3433_v6  ;;  %v1097_v23 = vrot.slane %v3876_v10, 1  ;;  %v703_v57 = vcombine.high %v658_v9, %v690_v47  ;;  %v914_v4 = vrot.slane %v702_v34, 7 }
 0x12c   : > { %v1103_v5 = vrot.slane %v3879_v39, 1  ;;  %v3906_v7 = vsel %vm875_vm0, 0.0, %v911_v38  ;;  %v3909_v27 = vsel %vm1041_vm2, %v1098_v51, %v1100_v15  ;;  %v1105_v61 = vrot.slane %v3894_v52, 1 }
 0x12d   : > { %5617 = vst [vmem:[#allocation44_spill] sm:$0xff] %v3906_v7  ;;  %5618 = vst [vmem:[#allocation45_spill] sm:$0xff] %v3909_v27  ;;  %v3912_v45 = vsel %vm1041_vm2, %v1097_v23, %v1098_v51  ;;  %v3922_v38 = vsel %vm875_vm0, %v914_v4, %v915_v36  ;;  %v3925_v9 = vsel %vm875_vm0, %v915_v36, 0.0  ;;  %v918_v47 = vrot.slane %v839_v44, 7 }
 0x12e   : > { %5619 = vst [vmem:[#allocation46_spill] sm:$0xff] %v3912_v45  ;;  %5620 = vst [vmem:[#allocation47_spill] sm:$0xff] %v3922_v38  ;;  %v840_v21 = vcombine.low %v3870_v33, %v3873_v40  ;;  %v1102_v62 = vrot.slane %v3906_v7, 1  ;;  %v704_v56 = vcombine.low %v3898_v29, %v3901_v24  ;;  %v917_v34 = vrot.slane %v703_v57, 7 }
 0x12f   : > { %1168 = vrot.lane.b32.xlu0 %v3909_v27, %s3159_s4  ;;  %1166 = vrot.lane.b32.xlu1 %v3912_v45, %s3159_s4  ;;  %v3933_v51 = vsel %vm875_vm0, 0.0, %v914_v4  ;;  %v3936_v15 = vsel %vm1041_vm2, %v1103_v5, %v1105_v61  ;;  %v1108_v36 = vrot.slane %v3922_v38, 1  ;;  %v1110_v44 = vrot.slane %v3925_v9, 1 }
 0x130   : > { %5621 = vst [vmem:[#allocation48_spill] sm:$0xff] %v3933_v51  ;;  %5622 = vst [vmem:[#allocation49_spill] sm:$0xff] %v3936_v15  ;;  %v3939_v23 = vsel %vm1041_vm2, %v1102_v62, %v1103_v5  ;;  %v3948_v57 = vsel %vm875_vm0, %v917_v34, %v918_v47  ;;  %v3951_v4 = vsel %vm875_vm0, %v918_v47, 0.0  ;;  %v921_v61 = vrot.slane %v840_v21, 7 }
 0x131   : > { %5623 = vst [vmem:[#allocation50_spill] sm:$0xff] %v3939_v23  ;;  %v1107_v5 = vrot.slane %v3933_v51, 1  ;;  %v920_v62 = vrot.slane %v704_v56, 7  ;;  %v3955_v6 = vsel %vm875_vm0, 0.0, %v917_v34  ;;  %v3958_v27 = vsel %vm1041_vm2, %v1108_v36, %v1110_v44 }
 0x132   : > { %5624 = vst [vmem:[#allocation51_spill] sm:$0xff] %v3958_v27  ;;  %v1115_v45 = vrot.slane %v3951_v4, 1  ;;  %v3973_v21 = vsel %vm875_vm0, %v921_v61, 0.0  ;;  %v1112_v56 = vrot.slane %v3955_v6, 1 }
 0x133   : > { %1172 = vrot.lane.b32.xlu0 %v3936_v15, %s3159_s4  ;;  %1170 = vrot.lane.b32.xlu1 %v3939_v23, %s3159_s4  ;;  %v3961_v15 = vsel %vm1041_vm2, %v1107_v5, %v1108_v36  ;;  %v1113_v23 = vrot.slane %v3948_v57, 1  ;;  %v3970_v47 = vsel %vm875_vm0, %v920_v62, %v921_v61  ;;  %v3977_v34 = vsel %vm875_vm0, 0.0, %v920_v62 }
 0x134   : > { %5625 = vst [vmem:[#allocation52_spill] sm:$0xff] %v3961_v15  ;;  %5626 = vst [vmem:[#allocation53_spill] sm:$0xff] %v3970_v47  ;;  %v1118_v5 = vrot.slane %v3970_v47, 1  ;;  %v1117_v61 = vrot.slane %v3977_v34, 1 }
 0x135   : > { %5627 = vst [vmem:[#allocation54_spill] sm:$0xff] %v3977_v34  ;;  %v3980_v36 = vsel %vm1041_vm2, %v1113_v23, %v1115_v45  ;;  %v3983_v44 = vsel %vm1041_vm2, %v1112_v56, %v1113_v23  ;;  %v1225_v23 = vrot.slane %v3544_v19, 2  ;;  %v1227_v56 = vrot.slane %v3547_v37, 2 }
 0x136   : > { %5628 = vst [vmem:[#allocation55_spill] sm:$0xff] %v3980_v36  ;;  %5629 = vst [vmem:[#allocation56_spill] sm:$0xff] %v3983_v44  ;;  %v3996_v45 = vsel %vm1041_vm2, %v1117_v61, %v1118_v5  ;;  %v1232_v61 = vrot.slane %v3553_v59, 2  ;;  %v1229_v37 = vrot.slane %v3559_v28, 2  ;;  %v1234_v59 = vrot.slane %v3604_v0, 2 }
 0x137   : > { %1176 = vrot.lane.b32.xlu0 %v3958_v27, %s3159_s4  ;;  %1174 = vrot.lane.b32.xlu1 %v3961_v15, %s3159_s4  ;;  %v1120_v27 = vrot.slane %v3973_v21, 1  ;;  %5631 = vst [vmem:[#allocation58_spill] sm:$0xff] %v3996_v45 }
 0x139   : > { %v3993_v62 = vsel %vm1041_vm2, %v1118_v5, %v1120_v27  ;;  %v4009_v27 = vsel %vm1218_vm1, %v1225_v23, %v1227_v56  ;;  %v1230_v5 = vrot.slane %v3550_v48, 2  ;;  %v1237_v56 = vrot.slane %v3583_v20, 2 }
 0x13a   : > { %5630 = vst [vmem:[#allocation57_spill] sm:$0xff] %v3993_v62  ;;  %v1239_v20 = vrot.slane %v3635_v2, 2 }
 0x13b   : > { %1180 = vrot.lane.b32.xlu0 %v3980_v36, %s3159_s4  ;;  %1178 = vrot.lane.b32.xlu1 %v3983_v44, %s3159_s4  ;;  %v1224_v36 = vrot.slane %v3536_v8, 2 }
 0x13d   : > { %v4006_v44 = vsel %vm1218_vm1, %v1224_v36, %v1225_v23  ;;  %v4022_v36 = vsel %vm1218_vm1, %v1230_v5, %v1232_v61  ;;  %v1235_v23 = vrot.slane %v3580_v1, 2  ;;  %v1242_v61 = vrot.slane %v3622_v58, 2 }
 0x13e   : > { %v1244_v58 = vrot.slane %v3669_v49, 2 }
 0x13f   : > { %1184 = vrot.lane.b32.xlu0 %v3993_v62, %s3159_s4  ;;  %1182 = vrot.lane.b32.xlu1 %v3996_v45, %s3159_s4  ;;  %v4019_v62 = vsel %vm1218_vm1, %v1229_v37, %v1230_v5  ;;  %v4032_v45 = vsel %vm1218_vm1, %v1234_v59, %v1235_v23  ;;  %v4035_v37 = vsel %vm1218_vm1, %v1235_v23, %v1237_v56  ;;  %v1240_v5 = vrot.slane %v3619_v42, 2  ;;  %s3068_s4 = scalar_lea.vmem %s5393_s10, 4096 }
 0x140   : > { %5632 = vst [vmem:[#allocation59_spill] sm:$0xff] %v4035_v37  ;;  %v1245_v23 = vrot.slane %v3650_v41, 2  ;;  %v1247_v56 = vrot.slane %v3653_v60, 2  ;;  %v1249_v60 = vrot.slane %v3704_v13, 2  ;;  %p3069_p3 = scmp.ne.s32.totalorder %s5393_s10, %s3068_s4 }
 0x141   : > { %v4045_v15 = vsel %vm1218_vm1, %v1239_v20, %v1240_v5  ;;  %v4048_v59 = vsel %vm1218_vm1, %v1240_v5, %v1242_v61  ;;  %v1250_v5 = vrot.slane %v3684_v43, 2  ;;  %v1252_v61 = vrot.slane %v3687_v55, 2 }
 0x142   : > { %5633 = vst [vmem:[#allocation60_spill] sm:$0xff] %v4048_v59  ;;  %v4061_v20 = vsel %vm1218_vm1, %v1245_v23, %v1247_v56  ;;  %v1257_v56 = vrot.slane %v3722_v17, 2  ;;  %v1254_v55 = vrot.slane %v3742_v18, 2  ;;  %v1259_v17 = vrot.slane %v3782_v26, 2  ;;  %p3070_p7 = pnand %p3069_p3, %p5896_p11 }
 0x143   : > { %1303 = vrot.lane.b32.xlu0 %v4006_v44, %s3158_s30  ;;  %1305 = vrot.lane.b32.xlu1 %v4009_v27, %s3158_s30  ;;  %5635 = vst [vmem:[#allocation62_spill] sm:$0xff] %v4061_v20 }
 0x144   : > { %p3071_p9 = pneg %p3070_p7 }
 0x147   : > { %1307 = vrot.lane.b32.xlu0 %v4019_v62, %s3158_s30  ;;  %1309 = vrot.lane.b32.xlu1 %v4022_v36, %s3158_s30 }
 0x14b   : > { %1311 = vrot.lane.b32.xlu0 %v4032_v45, %s3158_s30  ;;  %1313 = vrot.lane.b32.xlu1 %v4035_v37, %s3158_s30  ;;  %v4058_v37 = vsel %vm1218_vm1, %v1244_v58, %v1245_v23  ;;  %v4074_v58 = vsel %vm1218_vm1, %v1250_v5, %v1252_v61  ;;  %v1255_v23 = vrot.slane %v3719_v22, 2  ;;  %v1262_v61 = vrot.slane %v3760_v3, 2 }
 0x14c   : > { %5634 = vst [vmem:[#allocation61_spill] sm:$0xff] %v4058_v37  ;;  %5637 = vst [vmem:[#allocation64_spill] sm:$0xff] %v4074_v58  ;;  %v1264_v3 = vrot.slane %v3811_v30, 2 }
 0x14f   : > { %1315 = vrot.lane.b32.xlu0 %v4045_v15, %s3158_s30  ;;  %1317 = vrot.lane.b32.xlu1 %v4048_v59, %s3158_s30  ;;  %v4071_v59 = vsel %vm1218_vm1, %v1249_v60, %v1250_v5  ;;  %v4087_v60 = vsel %vm1218_vm1, %v1255_v23, %v1257_v56  ;;  %v1260_v5 = vrot.slane %v3757_v50, 2  ;;  %v1267_v56 = vrot.slane %v3800_v16, 2 }
 0x150   : > { %5636 = vst [vmem:[#allocation63_spill] sm:$0xff] %v4071_v59  ;;  %5639 = vst [vmem:[#allocation66_spill] sm:$0xff] %v4087_v60  ;;  %v1269_v16 = vrot.slane %v3843_v35, 2 }
 0x153   : > { %1319 = vrot.lane.b32.xlu0 %v4058_v37, %s3158_s30  ;;  %1321 = vrot.lane.b32.xlu1 %v4061_v20, %s3158_s30  ;;  %v4084_v20 = vsel %vm1218_vm1, %v1254_v55, %v1255_v23  ;;  %v4100_v55 = vsel %vm1218_vm1, %v1260_v5, %v1262_v61  ;;  %v1265_v23 = vrot.slane %v3797_v25, 2  ;;  %v1272_v61 = vrot.slane %v3830_v46, 2  ;;  %v4175_v37 = vpop.permute.xlu0 %2990 }
 0x154   : > { %5638 = vst [vmem:[#allocation65_spill] sm:$0xff] %v4084_v20  ;;  %5641 = vst [vmem:[#allocation68_spill] sm:$0xff] %v4100_v55  ;;  %v1274_v46 = vrot.slane %v3876_v10, 2 }
 0x157   : > { %1323 = vrot.lane.b32.xlu0 %v4071_v59, %s3158_s30  ;;  %1325 = vrot.lane.b32.xlu1 %v4074_v58, %s3158_s30  ;;  %v4097_v58 = vsel %vm1218_vm1, %v1259_v17, %v1260_v5  ;;  %v4113_v17 = vsel %vm1218_vm1, %v1265_v23, %v1267_v56  ;;  %v1270_v5 = vrot.slane %v3827_v12, 2  ;;  %v1277_v56 = vrot.slane %v3861_v31, 2 }
 0x158   : > { %5640 = vst [vmem:[#allocation67_spill] sm:$0xff] %v4097_v58  ;;  %5643 = vst [vmem:[#allocation70_spill] sm:$0xff] %v4113_v17  ;;  %v1279_v31 = vrot.slane %v3906_v7, 2 }
 0x15b   : > { %1327 = vrot.lane.b32.xlu0 %v4084_v20, %s3158_s30  ;;  %1329 = vrot.lane.b32.xlu1 %v4087_v60, %s3158_s30  ;;  %v4110_v60 = vsel %vm1218_vm1, %v1264_v3, %v1265_v23  ;;  %v4126_v3 = vsel %vm1218_vm1, %v1270_v5, %v1272_v61  ;;  %v1275_v23 = vrot.slane %v3858_v63, 2  ;;  %v1282_v61 = vrot.slane %v3894_v52, 2 }
 0x15c   : > { %5642 = vst [vmem:[#allocation69_spill] sm:$0xff] %v4110_v60  ;;  %v1284_v52 = vrot.slane %v3933_v51, 2 }
 0x15f   : > { %1331 = vrot.lane.b32.xlu0 %v4097_v58, %s3158_s30  ;;  %1333 = vrot.lane.b32.xlu1 %v4100_v55, %s3158_s30  ;;  %v4123_v55 = vsel %vm1218_vm1, %v1269_v16, %v1270_v5  ;;  %v4136_v58 = vsel %vm1218_vm1, %v1274_v46, %v1275_v23  ;;  %v4139_v16 = vsel %vm1218_vm1, %v1275_v23, %v1277_v56  ;;  %v1280_v5 = vrot.slane %v3879_v39, 2 }
 0x160   : > { %v1285_v23 = vrot.slane %v3922_v38, 2  ;;  %v1287_v56 = vrot.slane %v3925_v9, 2  ;;  %v4173_v9 = vpop.permute.xlu1 %2995 }
 0x161   : > { %v4149_v20 = vsel %vm1218_vm1, %v1279_v31, %v1280_v5  ;;  %v4152_v46 = vsel %vm1218_vm1, %v1280_v5, %v1282_v61  ;;  %v1290_v5 = vrot.slane %v3948_v57, 2  ;;  %v1292_v61 = vrot.slane %v3951_v4, 2  ;;  %5647 = vst [vmem:[#allocation74_spill] sm:$0xff] %v4173_v9 }
 0x162   : > { %5644 = vst [vmem:[#allocation71_spill] sm:$0xff] %v4152_v46  ;;  %v4162_v59 = vsel %vm1218_vm1, %v1284_v52, %v1285_v23  ;;  %v4165_v31 = vsel %vm1218_vm1, %v1285_v23, %v1287_v56  ;;  %v1289_v52 = vrot.slane %v3955_v6, 2  ;;  %v1295_v4 = vrot.slane %v3970_v47, 2 }
 0x163   : > { %1335 = vrot.lane.b32.xlu0 %v4110_v60, %s3158_s30  ;;  %1337 = vrot.lane.b32.xlu1 %v4113_v17, %s3158_s30  ;;  %5645 = vst [vmem:[#allocation72_spill] sm:$0xff] %v4162_v59  ;;  %5646 = vst [vmem:[#allocation73_spill] sm:$0xff] %v4165_v31  ;;  %v4182_v23 = vsel %vm1218_vm1, %v1290_v5, %v1292_v61  ;;  %v1297_v56 = vrot.slane %v3973_v21, 2 }
 0x164   : > { %5649 = vst [vmem:[#allocation76_spill] sm:$0xff] %v4182_v23 }
 0x167   : > { %1339 = vrot.lane.b32.xlu0 %v4123_v55, %s3158_s30  ;;  %1341 = vrot.lane.b32.xlu1 %v4126_v3, %s3158_s30 }
 0x16b   : > { %1343 = vrot.lane.b32.xlu0 %v4136_v58, %s3158_s30  ;;  %1345 = vrot.lane.b32.xlu1 %v4139_v16, %s3158_s30 }
 0x16f   : > { %1347 = vrot.lane.b32.xlu0 %v4149_v20, %s3158_s30  ;;  %1349 = vrot.lane.b32.xlu1 %v4152_v46, %s3158_s30  ;;  %v4179_v46 = vsel %vm1218_vm1, %v1289_v52, %v1290_v5  ;;  %v4199_v5 = vsel %vm1218_vm1, %v1295_v4, %v1297_v56 }
 0x170   : > { %5648 = vst [vmem:[#allocation75_spill] sm:$0xff] %v4179_v46  ;;  %5652 = vst [vmem:[#allocation79_spill] sm:$0xff] %v4199_v5 }
 0x173   : > { %1351 = vrot.lane.b32.xlu0 %v4162_v59, %s3158_s30  ;;  %1353 = vrot.lane.b32.xlu1 %v4165_v31, %s3158_s30  ;;  %v1294_v31 = vrot.slane %v3977_v34, 2 }
 0x175   : > { %v4196_v52 = vsel %vm1218_vm1, %v1294_v31, %v1295_v4 }
 0x176   : > { %5651 = vst [vmem:[#allocation78_spill] sm:$0xff] %v4196_v52 }
 0x177   : > { %1355 = vrot.lane.b32.xlu0 %v4179_v46, %s3158_s30  ;;  %1357 = vrot.lane.b32.xlu1 %v4182_v23, %s3158_s30 }
 0x179   : > { %v4191_v59 = vpop.permute.xlu1 %1126  ;;  %v4193_v9 = vpop.permute.xlu0 %1128 }
 0x17a   : > { %5650 = vst [vmem:[#allocation77_spill] sm:$0xff] %v4193_v9  ;;  %v5708_v9 = vld [vmem:[#allocation38_spill] sm:$0xff] }
 0x17b   : > { %1359 = vrot.lane.b32.xlu0 %v4196_v52, %s3158_s30  ;;  %1361 = vrot.lane.b32.xlu1 %v4199_v5, %s3158_s30 }
 0x17d   : > { %v4205_v21 = vpop.permute.xlu1 %1130  ;;  %v4207_v61 = vpop.permute.xlu0 %1132 }
 0x17e   : > { %5653 = vst [vmem:[#allocation80_spill] sm:$0xff] %v4205_v21  ;;  %5654 = vst [vmem:[#allocation81_spill] sm:$0xff] %v4207_v61 }
 0x17f   : > { %1396 = vrot.lane.b32.xlu0 %v3536_v8, %s3162_s20  ;;  %1398 = vrot.lane.b32.xlu1 %v3544_v19, %s3162_s20  ;;  %v5707_v19 = vld [vmem:[#allocation37_spill] sm:$0xff] }
 0x181   : > { %v4213_v31 = vpop.permute.xlu1 %1134  ;;  %v4215_v4 = vpop.permute.xlu0 %1136 }
 0x182   : > { %5655 = vst [vmem:[#allocation82_spill] sm:$0xff] %v4213_v31  ;;  %5656 = vst [vmem:[#allocation83_spill] sm:$0xff] %v4215_v4 }
 0x183   : > { %1400 = vrot.lane.b32.xlu0 %v3559_v28, %s3162_s20  ;;  %1402 = vrot.lane.b32.xlu1 %v3550_v48, %s3162_s20 }
 0x185   : > { %v4221_v56 = vpop.permute.xlu1 %1138  ;;  %v4223_v5 = vpop.permute.xlu0 %1140 }
 0x186   : > { %5657 = vst [vmem:[#allocation84_spill] sm:$0xff] %v4221_v56  ;;  %5658 = vst [vmem:[#allocation85_spill] sm:$0xff] %v4223_v5 }
 0x187   : > { %1404 = vrot.lane.b32.xlu0 %v3604_v0, %s3162_s20  ;;  %1406 = vrot.lane.b32.xlu1 %v3580_v1, %s3162_s20 }
 0x189   : > { %v4229_v61 = vpop.permute.xlu1 %1142  ;;  %v4231_v31 = vpop.permute.xlu0 %1144 }
 0x18a   : > { %5659 = vst [vmem:[#allocation86_spill] sm:$0xff] %v4229_v61  ;;  %5660 = vst [vmem:[#allocation87_spill] sm:$0xff] %v4231_v31 }
 0x18b   : > { %1408 = vrot.lane.b32.xlu0 %v3635_v2, %s3162_s20  ;;  %1410 = vrot.lane.b32.xlu1 %v3619_v42, %s3162_s20 }
 0x18d   : > { %v4237_v4 = vpop.permute.xlu1 %1146  ;;  %v4239_v56 = vpop.permute.xlu0 %1148 }
 0x18e   : > { %5661 = vst [vmem:[#allocation88_spill] sm:$0xff] %v4237_v4  ;;  %5662 = vst [vmem:[#allocation89_spill] sm:$0xff] %v4239_v56 }
 0x18f   : > { %1412 = vrot.lane.b32.xlu0 %v3669_v49, %s3162_s20  ;;  %1414 = vrot.lane.b32.xlu1 %v3650_v41, %s3162_s20 }
 0x191   : > { %v4245_v5 = vpop.permute.xlu1 %1150  ;;  %v4247_v61 = vpop.permute.xlu0 %1152 }
 0x192   : > { %5663 = vst [vmem:[#allocation90_spill] sm:$0xff] %v4245_v5  ;;  %5664 = vst [vmem:[#allocation91_spill] sm:$0xff] %v4247_v61 }
 0x193   : > { %1416 = vrot.lane.b32.xlu0 %v3704_v13, %s3162_s20  ;;  %1418 = vrot.lane.b32.xlu1 %v3684_v43, %s3162_s20 }
 0x195   : > { %v4253_v31 = vpop.permute.xlu1 %1154  ;;  %v4255_v4 = vpop.permute.xlu0 %1156 }
 0x197   : > { %1420 = vrot.lane.b32.xlu0 %v3742_v18, %s3162_s20  ;;  %1422 = vrot.lane.b32.xlu1 %v3719_v22, %s3162_s20 }
 0x199   : > { %v4261_v56 = vpop.permute.xlu1 %1158  ;;  %v4263_v5 = vpop.permute.xlu0 %1160 }
 0x19a   : > { %5665 = vst [vmem:[#allocation92_spill] sm:$0xff] %v4263_v5 }
 0x19b   : > { %1424 = vrot.lane.b32.xlu0 %v3782_v26, %s3162_s20  ;;  %1426 = vrot.lane.b32.xlu1 %v3757_v50, %s3162_s20 }
 0x19d   : > { %v4269_v61 = vpop.permute.xlu1 %1162  ;;  %v4271_v52 = vpop.permute.xlu0 %1164 }
 0x19e   : > { %5666 = vst [vmem:[#allocation93_spill] sm:$0xff] %v4269_v61  ;;  %5667 = vst [vmem:[#allocation94_spill] sm:$0xff] %v4271_v52 }
 0x19f   : > { %1428 = vrot.lane.b32.xlu0 %v3811_v30, %s3162_s20  ;;  %1430 = vrot.lane.b32.xlu1 %v3797_v25, %s3162_s20  ;;  %v5679_v25 = vcombine.high %v3870_v33, %v3873_v40 }
 0x1a1   : > { %v4277_v21 = vpop.permute.xlu1 %1166  ;;  %v4279_v22 = vpop.permute.xlu0 %1168 }
 0x1a2   : > { %5668 = vst [vmem:[#allocation95_spill] sm:$0xff] %v4277_v21  ;;  %5669 = vst [vmem:[#allocation96_spill] sm:$0xff] %v4279_v22 }
 0x1a3   : > { %1432 = vrot.lane.b32.xlu0 %v3843_v35, %s3162_s20  ;;  %1434 = vrot.lane.b32.xlu1 %v3827_v12, %s3162_s20 }
 0x1a5   : > { %v4285_v18 = vpop.permute.xlu1 %1170  ;;  %v4287_v61 = vpop.permute.xlu0 %1172 }
 0x1a6   : > { %5670 = vst [vmem:[#allocation97_spill] sm:$0xff] %v4285_v18  ;;  %5671 = vst [vmem:[#allocation98_spill] sm:$0xff] %v4287_v61 }
 0x1a7   : > { %1436 = vrot.lane.b32.xlu0 %v3876_v10, %s3162_s20  ;;  %1438 = vrot.lane.b32.xlu1 %v3858_v63, %s3162_s20 }
 0x1a9   : > { %v4293_v52 = vpop.permute.xlu1 %1174  ;;  %v4295_v21 = vpop.permute.xlu0 %1176 }
 0x1aa   : > { %5672 = vst [vmem:[#allocation99_spill] sm:$0xff] %v4293_v52  ;;  %5673 = vst [vmem:[#allocation100_spill] sm:$0xff] %v4295_v21  ;;  %v705_v21 = vcombine.high %v3898_v29, %v3901_v24 }
 0x1ab   : > { %1440 = vrot.lane.b32.xlu0 %v3906_v7, %s3162_s20  ;;  %1442 = vrot.lane.b32.xlu1 %v3879_v39, %s3162_s20 }
 0x1ac   : > { %v923_v23 = vrot.slane %v705_v21, 7 }
 0x1ad   : > { %v4301_v22 = vpop.permute.xlu1 %1178  ;;  %v4303_v18 = vpop.permute.xlu0 %1180 }
 0x1ae   : > { %5674 = vst [vmem:[#allocation101_spill] sm:$0xff] %v4301_v22  ;;  %5675 = vst [vmem:[#allocation102_spill] sm:$0xff] %v4303_v18 }
 0x1af   : > { %1444 = vrot.lane.b32.xlu0 %v3933_v51, %s3162_s20  ;;  %1446 = vrot.lane.b32.xlu1 %v3922_v38, %s3162_s20 }
 0x1b1   : > { %v4309_v61 = vpop.permute.xlu1 %1182  ;;  %v4311_v52 = vpop.permute.xlu0 %1184 }
 0x1b2   : > { %5676 = vst [vmem:[#allocation103_spill] sm:$0xff] %v4309_v61  ;;  %5677 = vst [vmem:[#allocation104_spill] sm:$0xff] %v4311_v52  ;;  %v4326_v61 = vrot.slane %v5679_v25, 7  ;;  %v4337_v52 = vsel %vm875_vm0, 0.0, %v923_v23 }
 0x1b3   : > { %1448 = vrot.lane.b32.xlu0 %v3955_v6, %s3162_s20  ;;  %1450 = vrot.lane.b32.xlu1 %v3948_v57, %s3162_s20  ;;  %5683 = vst [vmem:[#allocation109_spill] sm:$0xff] %v4337_v52 }
 0x1b4   : > { %5680 = vst [vmem:[#allocation106_spill] sm:$0xff] %v4326_v61  ;;  %v4341_v21 = vsel %vm875_vm0, %v923_v23, %v4326_v61  ;;  %v5689_v61 = vld [vmem:[#allocation19_spill] sm:$0xff] }
 0x1b5   : > { %v4319_v18 = vpop.permute.xlu1 %1305  ;;  %v4321_v22 = vpop.permute.xlu0 %1303  ;;  %5684 = vst [vmem:[#allocation110_spill] sm:$0xff] %v4341_v21 }
 0x1b6   : > { %5678 = vst [vmem:[#allocation105_spill] sm:$0xff] %v4319_v18 }
 0x1b7   : > { %1452 = vrot.lane.b32.xlu0 %v3977_v34, %s3162_s20  ;;  %1454 = vrot.lane.b32.xlu1 %v3970_v47, %s3162_s20  ;;  %v5704_v34 = vld [vmem:[#allocation33_spill] sm:$0xff] }
 0x1b9   : > { %v4332_v29 = vpop.permute.xlu1 %1309  ;;  %v4334_v24 = vpop.permute.xlu0 %1307 }
 0x1ba   : > { %5681 = vst [vmem:[#allocation107_spill] sm:$0xff] %v4332_v29  ;;  %5682 = vst [vmem:[#allocation108_spill] sm:$0xff] %v4334_v24  ;;  %v5701_v24 = vld [vmem:[#allocation30_spill] sm:$0xff] }
 0x1bb   : > { %1456 = vrot.lane.b32.xlu0 %v4337_v52, %s3162_s20  ;;  %1458 = vrot.lane.b32.xlu1 %v4341_v21, %s3162_s20  ;;  %v5690_v21 = vld [vmem:[#allocation18_spill] sm:$0xff]  ;;  %s3168_s20 = smov [#allocation7]  }
 0x1bc   : > { %v5693_v52 = vld [vmem:[#allocation22_spill] sm:$0xff] }
 0x1bd   : > { %v4347_v25 = vpop.permute.xlu1 %1313  ;;  %v4349_v33 = vpop.permute.xlu0 %1311 }
 0x1be   : > { %5685 = vst [vmem:[#allocation111_spill] sm:$0xff] %v4347_v25  ;;  %5686 = vst [vmem:[#allocation112_spill] sm:$0xff] %v4349_v33 }
 0x1bf   : > { %1498 = vrot.lane.b32.xlu0 %v3571_v54, %s3163_s28  ;;  %1500 = vrot.lane.b32.xlu1 %v3568_v53, %s3163_s28  ;;  %v5694_v54 = vld [vmem:[#allocation23_spill] sm:$0xff] }
 0x1c1   : > { %v4355_v40 = vpop.permute.xlu1 %1317  ;;  %v4357_v23 = vpop.permute.xlu0 %1315 }
 0x1c2   : > { %5687 = vst [vmem:[#allocation113_spill] sm:$0xff] %v4355_v40  ;;  %5688 = vst [vmem:[#allocation114_spill] sm:$0xff] %v4357_v23 }
 0x1c3   : > { %1502 = vrot.lane.b32.xlu0 %v5689_v61, %s3163_s28  ;;  %1504 = vrot.lane.b32.xlu1 %v5690_v21, %s3163_s28 }
 0x1c5   : > { %v4363_v25 = vpop.permute.xlu1 %1321  ;;  %v4365_v33 = vpop.permute.xlu0 %1319 }
 0x1c6   : > { %5691 = vst [vmem:[#allocation19_spill] sm:$0xff] %v4363_v25  ;;  %5692 = vst [vmem:[#allocation18_spill] sm:$0xff] %v4365_v33  ;;  %v5699_v33 = vld [vmem:[#allocation26_spill] sm:$0xff] }
 0x1c7   : > { %1508 = vrot.lane.b32.xlu1 %v5693_v52, %s3163_s28  ;;  %1506 = vrot.lane.b32.xlu0 %v5694_v54, %s3163_s28 }
 0x1c9   : > { %v4371_v53 = vpop.permute.xlu1 %1325  ;;  %v4373_v40 = vpop.permute.xlu0 %1323 }
 0x1ca   : > { %5695 = vst [vmem:[#allocation22_spill] sm:$0xff] %v4371_v53  ;;  %5696 = vst [vmem:[#allocation23_spill] sm:$0xff] %v4373_v40  ;;  %v5700_v40 = vld [vmem:[#allocation29_spill] sm:$0xff] }
 0x1cb   : > { %1512 = vrot.lane.b32.xlu1 %v3672_v11, %s3163_s28  ;;  %1510 = vrot.lane.b32.xlu0 %v3675_v14, %s3163_s28 }
 0x1cd   : > { %v4379_v23 = vpop.permute.xlu1 %1329  ;;  %v4381_v25 = vpop.permute.xlu0 %1327 }
 0x1ce   : > { %5697 = vst [vmem:[#allocation115_spill] sm:$0xff] %v4379_v23  ;;  %5698 = vst [vmem:[#allocation116_spill] sm:$0xff] %v4381_v25  ;;  %v5703_v25 = vld [vmem:[#allocation32_spill] sm:$0xff] }
 0x1cf   : > { %1516 = vrot.lane.b32.xlu1 %v3707_v32, %s3163_s28  ;;  %1514 = vrot.lane.b32.xlu0 %v5699_v33, %s3163_s28 }
 0x1d1   : > { %v4387_v29 = vpop.permute.xlu1 %1333  ;;  %v4389_v53 = vpop.permute.xlu0 %1331 }
 0x1d3   : > { %1520 = vrot.lane.b32.xlu1 %v5700_v40, %s3163_s28  ;;  %1518 = vrot.lane.b32.xlu0 %v5701_v24, %s3163_s28 }
 0x1d5   : > { %v4395_v47 = vpop.permute.xlu1 %1337  ;;  %v4397_v23 = vpop.permute.xlu0 %1335 }
 0x1d6   : > { %5702 = vst [vmem:[#allocation26_spill] sm:$0xff] %v4395_v47 }
 0x1d7   : > { %1524 = vrot.lane.b32.xlu1 %v5703_v25, %s3163_s28  ;;  %1522 = vrot.lane.b32.xlu0 %v5704_v34, %s3163_s28 }
 0x1d9   : > { %v4403_v18 = vpop.permute.xlu1 %1341  ;;  %v4405_v5 = vpop.permute.xlu0 %1339 }
 0x1da   : > { %5705 = vst [vmem:[#allocation29_spill] sm:$0xff] %v4403_v18  ;;  %5706 = vst [vmem:[#allocation30_spill] sm:$0xff] %v4405_v5 }
 0x1db   : > { %1532 = vrot.lane.b32.xlu1 %v5707_v19, %s3163_s28  ;;  %1530 = vrot.lane.b32.xlu0 %v5708_v9, %s3163_s28 }
 0x1dd   : > { %v4411_v46 = vpop.permute.xlu1 %1345  ;;  %v4413_v47 = vpop.permute.xlu0 %1343 }
 0x1de   : > { %5709 = vst [vmem:[#allocation32_spill] sm:$0xff] %v4411_v46  ;;  %5710 = vst [vmem:[#allocation33_spill] sm:$0xff] %v4413_v47 }
 0x1df   : > { %1631 = vrot.lane.b32.xlu1 %v4110_v60, %s3164_s18  ;;  %1599 = vrot.lane.b32.xlu0 %v4006_v44, %s3164_s18  ;;  %v2247_v60 = vld [vmem:[#allocation5] sm:$0xff] }
 0x1e1   : > { %v4419_v18 = vpop.permute.xlu1 %1349  ;;  %v4421_v5 = vpop.permute.xlu0 %1347 }
 0x1e2   : > { %5711 = vst [vmem:[#allocation117_spill] sm:$0xff] %v4419_v18  ;;  %5712 = vst [vmem:[#allocation118_spill] sm:$0xff] %v4421_v5  ;;  %v2250_v5 = vld [vmem:[#allocation5 + $0x18] sm:$0xff] }
 0x1e3   : > { %1633 = vrot.lane.b32.xlu1 %v4113_v17, %s3164_s18  ;;  %1601 = vrot.lane.b32.xlu0 %v4009_v27, %s3164_s18  ;;  %v2251_v27 = vld [vmem:[#allocation5 + $0x20] sm:$0xf] }
 0x1e4   : > { %2835 = vmatprep.subr.msk.mxu0 %vm2356_vm3, %v2251_v27  ;;  %2893 = vmatprep.subr.msk.mxu1 %vm2356_vm3, %v2251_v27 }
 0x1e5   : > { %v4427_v19 = vpop.permute.xlu1 %1353  ;;  %v4429_v9 = vpop.permute.xlu0 %1351  ;;  %2836 = vmatpush3.msk.msra.mxu0 %vm2356_vm3, %v2251_v27  ;;  %2898 = vmatpush3.msk.msra.mxu1 %vm2356_vm3, %v2251_v27  ;;  %v2248_v27 = vld [vmem:[#allocation5 + $0x8] sm:$0xff] }
 0x1e6   : > { %5713 = vst [vmem:[#allocation119_spill] sm:$0xff] %v4427_v19  ;;  %5714 = vst [vmem:[#allocation120_spill] sm:$0xff] %v4429_v9  ;;  %2837 = vmatprep.subr.mxu0 %v2250_v5  ;;  %2894 = vmatprep.subr.mxu1 %v2250_v5 }
 0x1e7   : > { %1727 = vrot.lane.b32.xlu1 %v3843_v35, %s3165_s29  ;;  %1695 = vrot.lane.b32.xlu0 %v3559_v28, %s3165_s29 }
 0x1e8   : > { %2838 = vmatpush3.msra.mxu0 %v2250_v5  ;;  %2899 = vmatpush3.msra.mxu1 %v2250_v5  ;;  %v5720_v5 = vld [vmem:[#allocation42_spill] sm:$0xff] }
 0x1e9   : > { %v4435_v44 = vpop.permute.xlu1 %1357  ;;  %v4437_v18 = vpop.permute.xlu0 %1355 }
 0x1ea   : > { %5715 = vst [vmem:[#allocation121_spill] sm:$0xff] %v4435_v44  ;;  %5716 = vst [vmem:[#allocation122_spill] sm:$0xff] %v4437_v18  ;;  %v5719_v44 = vld [vmem:[#allocation43_spill] sm:$0xff]  ;;  %v2249_v18 = vld [vmem:[#allocation5 + $0x10] sm:$0xff] }
 0x1eb   : > { %1729 = vrot.lane.b32.xlu1 %v3827_v12, %s3165_s29  ;;  %1697 = vrot.lane.b32.xlu0 %v3550_v48, %s3165_s29 }
 0x1ec   : > { %2839 = vmatprep.subr.mxu0 %v2249_v18  ;;  %2895 = vmatprep.subr.mxu1 %v2249_v18 }
 0x1ed   : > { %v4443_v19 = vpop.permute.xlu1 %1361  ;;  %v4445_v9 = vpop.permute.xlu0 %1359  ;;  %2840 = vmatpush3.msra.mxu0 %v2249_v18  ;;  %2900 = vmatpush3.msra.mxu1 %v2249_v18 }
 0x1ee   : > { %5717 = vst [vmem:[#allocation123_spill] sm:$0xff] %v4443_v19  ;;  %5718 = vst [vmem:[#allocation124_spill] sm:$0xff] %v4445_v9  ;;  %2841 = vmatprep.subr.mxu0 %v2248_v27  ;;  %2896 = vmatprep.subr.mxu1 %v2248_v27 }
 0x1ef   : > { %1823 = vrot.lane.b32.xlu1 %v5719_v44, %s3166_s17  ;;  %1791 = vrot.lane.b32.xlu0 %v5689_v61, %s3166_s17 }
 0x1f0   : > { %2842 = vmatpush3.msra.mxu0 %v2248_v27  ;;  %2901 = vmatpush3.msra.mxu1 %v2248_v27 }
 0x1f1   : > { %v4451_v17 = vpop.permute.xlu1 %1398  ;;  %v4453_v19 = vpop.permute.xlu0 %1396  ;;  %2843 = vmatprep.subr.mxu0 %v2247_v60  ;;  %2897 = vmatprep.subr.mxu1 %v2247_v60 }
 0x1f2   : > { %2844 = vmatpush3.msra.mxu0 %v2247_v60  ;;  %2902 = vmatpush3.msra.mxu1 %v2247_v60 }
 0x1f3   : > { %1793 = vrot.lane.b32.xlu1 %v5690_v21, %s3166_s17  ;;  %1534 = vrot.lane.b32.xlu0 %v5719_v44, %s3163_s28 }
 0x1f5   : > { %v4459_v61 = vpop.permute.xlu1 %1402  ;;  %v4461_v9 = vpop.permute.xlu0 %1400 }
 0x1f7   : > { %1887 = vrot.lane.b32.xlu1 %v4019_v62, %s3167_s22  ;;  %1825 = vrot.lane.b32.xlu0 %v5720_v5, %s3166_s17 }
 0x1f9   : > { %v4467_v21 = vpop.permute.xlu1 %1406  ;;  %v4469_v18 = vpop.permute.xlu0 %1404 }
 0x1fa   : > { %5721 = vst [vmem:[#allocation43_spill] sm:$0xff] %v4467_v21 }
 0x1fb   : > { %1536 = vrot.lane.b32.xlu1 %v5720_v5, %s3163_s28  ;;  %1919 = vrot.lane.b32.xlu0 %v4123_v55, %s3167_s22 }
 0x1fd   : > { %v4475_v44 = vpop.permute.xlu1 %1410  ;;  %v4477_v27 = vpop.permute.xlu0 %1408 }
 0x1fe   : > { %5722 = vst [vmem:[#allocation42_spill] sm:$0xff] %v4475_v44  ;;  %5723 = vst [vmem:[#allocation125_spill] sm:$0xff] %v4477_v27  ;;  %v5762_v27 = vld [vmem:[#allocation61_spill] sm:$0xff] }
 0x1ff   : > { %1635 = vrot.lane.b32.xlu1 %v4123_v55, %s3164_s18  ;;  %1603 = vrot.lane.b32.xlu0 %v4019_v62, %s3164_s18 }
 0x201   : > { %v4483_v46 = vpop.permute.xlu1 %1414  ;;  %v4485_v47 = vpop.permute.xlu0 %1412 }
 0x202   : > { %5724 = vst [vmem:[#allocation126_spill] sm:$0xff] %v4483_v46  ;;  %5725 = vst [vmem:[#allocation127_spill] sm:$0xff] %v4485_v47  ;;  %v5734_v47 = vld [vmem:[#allocation45_spill] sm:$0xff] }
 0x203   : > { %1921 = vrot.lane.b32.xlu1 %v4126_v3, %s3167_s22  ;;  %1889 = vrot.lane.b32.xlu0 %v4022_v36, %s3167_s22 }
 0x205   : > { %v4491_v60 = vpop.permute.xlu1 %1418  ;;  %v4493_v5 = vpop.permute.xlu0 %1416 }
 0x206   : > { %5726 = vst [vmem:[#allocation128_spill] sm:$0xff] %v4491_v60  ;;  %5727 = vst [vmem:[#allocation129_spill] sm:$0xff] %v4493_v5 }
 0x207   : > { %1637 = vrot.lane.b32.xlu1 %v4126_v3, %s3164_s18  ;;  %1605 = vrot.lane.b32.xlu0 %v4022_v36, %s3164_s18 }
 0x209   : > { %v4499_v62 = vpop.permute.xlu1 %1422  ;;  %v4501_v55 = vpop.permute.xlu0 %1420 }
 0x20a   : > { %5728 = vst [vmem:[#allocation130_spill] sm:$0xff] %v4499_v62  ;;  %5729 = vst [vmem:[#allocation131_spill] sm:$0xff] %v4501_v55  ;;  %v5732_v62 = vld [vmem:[#allocation46_spill] sm:$0xff] }
 0x20b   : > { %1731 = vrot.lane.b32.xlu1 %v3876_v10, %s3165_s29  ;;  %1699 = vrot.lane.b32.xlu0 %v3604_v0, %s3165_s29  ;;  %v5763_v0 = vld [vmem:[#allocation51_spill] sm:$0xff] }
 0x20d   : > { %v4507_v46 = vpop.permute.xlu1 %1426  ;;  %v4509_v60 = vpop.permute.xlu0 %1424 }
 0x20e   : > { %5730 = vst [vmem:[#allocation132_spill] sm:$0xff] %v4507_v46  ;;  %5731 = vst [vmem:[#allocation133_spill] sm:$0xff] %v4509_v60 }
 0x20f   : > { %1733 = vrot.lane.b32.xlu1 %v3858_v63, %s3165_s29  ;;  %1701 = vrot.lane.b32.xlu0 %v3580_v1, %s3165_s29 }
 0x211   : > { %v4515_v36 = vpop.permute.xlu1 %1430  ;;  %v4517_v3 = vpop.permute.xlu0 %1428 }
 0x213   : > { %1827 = vrot.lane.b32.xlu1 %v5732_v62, %s3166_s17  ;;  %1795 = vrot.lane.b32.xlu0 %v5694_v54, %s3166_s17 }
 0x215   : > { %v4523_v55 = vpop.permute.xlu1 %1434  ;;  %v4525_v46 = vpop.permute.xlu0 %1432 }
 0x217   : > { %1797 = vrot.lane.b32.xlu1 %v5693_v52, %s3166_s17  ;;  %1538 = vrot.lane.b32.xlu0 %v5732_v62, %s3163_s28 }
 0x219   : > { %v4531_v60 = vpop.permute.xlu1 %1438  ;;  %v4533_v5 = vpop.permute.xlu0 %1436 }
 0x21a   : > { %5733 = vst [vmem:[#allocation46_spill] sm:$0xff] %v4531_v60 }
 0x21b   : > { %1891 = vrot.lane.b32.xlu1 %v4032_v45, %s3167_s22  ;;  %1829 = vrot.lane.b32.xlu0 %v5734_v47, %s3166_s17 }
 0x21d   : > { %v4539_v54 = vpop.permute.xlu1 %1442  ;;  %v4541_v44 = vpop.permute.xlu0 %1440 }
 0x21e   : > { %5735 = vst [vmem:[#allocation45_spill] sm:$0xff] %v4539_v54  ;;  %5736 = vst [vmem:[#allocation134_spill] sm:$0xff] %v4541_v44  ;;  %v5761_v44 = vld [vmem:[#allocation12_spill] sm:$0xff] }
 0x21f   : > { %1540 = vrot.lane.b32.xlu1 %v5734_v47, %s3163_s28  ;;  %1923 = vrot.lane.b32.xlu0 %v4136_v58, %s3167_s22  ;;  %v5741_v47 = vld [vmem:[#allocation59_spill] sm:$0xff] }
 0x221   : > { %v4547_v52 = vpop.permute.xlu1 %1446  ;;  %v4549_v62 = vpop.permute.xlu0 %1444 }
 0x222   : > { %5737 = vst [vmem:[#allocation135_spill] sm:$0xff] %v4547_v52  ;;  %5738 = vst [vmem:[#allocation136_spill] sm:$0xff] %v4549_v62 }
 0x223   : > { %1639 = vrot.lane.b32.xlu1 %v4136_v58, %s3164_s18  ;;  %1607 = vrot.lane.b32.xlu0 %v4032_v45, %s3164_s18 }
 0x225   : > { %v4555_v63 = vpop.permute.xlu1 %1450  ;;  %v4557_v54 = vpop.permute.xlu0 %1448 }
 0x226   : > { %5739 = vst [vmem:[#allocation137_spill] sm:$0xff] %v4555_v63  ;;  %5740 = vst [vmem:[#allocation138_spill] sm:$0xff] %v4557_v54 }
 0x227   : > { %1925 = vrot.lane.b32.xlu1 %v4139_v16, %s3167_s22  ;;  %1893 = vrot.lane.b32.xlu0 %v5741_v47, %s3167_s22 }
 0x229   : > { %v4563_v1 = vpop.permute.xlu1 %1454  ;;  %v4565_v52 = vpop.permute.xlu0 %1452 }
 0x22a   : > { %5742 = vst [vmem:[#allocation59_spill] sm:$0xff] %v4563_v1  ;;  %5743 = vst [vmem:[#allocation139_spill] sm:$0xff] %v4565_v52 }
 0x22b   : > { %1641 = vrot.lane.b32.xlu1 %v4139_v16, %s3164_s18  ;;  %1609 = vrot.lane.b32.xlu0 %v5741_v47, %s3164_s18 }
 0x22d   : > { %v4571_v45 = vpop.permute.xlu1 %1458  ;;  %v4573_v58 = vpop.permute.xlu0 %1456 }
 0x22e   : > { %5744 = vst [vmem:[#allocation140_spill] sm:$0xff] %v4571_v45  ;;  %5745 = vst [vmem:[#allocation141_spill] sm:$0xff] %v4573_v58  ;;  %v5746_v58 = vld [vmem:[#allocation50_spill] sm:$0xff] }
 0x22f   : > { %1735 = vrot.lane.b32.xlu1 %v3906_v7, %s3165_s29  ;;  %1703 = vrot.lane.b32.xlu0 %v3635_v2, %s3165_s29 }
 0x231   : > { %v4579_v63 = vpop.permute.xlu1 %1500  ;;  %v4581_v1 = vpop.permute.xlu0 %1498 }
 0x233   : > { %1737 = vrot.lane.b32.xlu1 %v3879_v39, %s3165_s29  ;;  %1705 = vrot.lane.b32.xlu0 %v3619_v42, %s3165_s29  ;;  %v5750_v42 = vld [vmem:[#allocation49_spill] sm:$0xff] }
 0x235   : > { %v4587_v16 = vpop.permute.xlu1 %1504  ;;  %v4589_v47 = vpop.permute.xlu0 %1502 }
 0x237   : > { %1831 = vrot.lane.b32.xlu1 %v5746_v58, %s3166_s17  ;;  %1799 = vrot.lane.b32.xlu0 %v3675_v14, %s3166_s17 }
 0x239   : > { %v4595_v45 = vpop.permute.xlu1 %1508  ;;  %v4597_v52 = vpop.permute.xlu0 %1506 }
 0x23a   : > { %5747 = vst [vmem:[#allocation50_spill] sm:$0xff] %v4595_v45 }
 0x23b   : > { %1801 = vrot.lane.b32.xlu1 %v3672_v11, %s3166_s17  ;;  %1542 = vrot.lane.b32.xlu0 %v5746_v58, %s3163_s28 }
 0x23d   : > { %v4603_v54 = vpop.permute.xlu1 %1512  ;;  %v4605_v39 = vpop.permute.xlu0 %1510 }
 0x23e   : > { %5748 = vst [vmem:[#allocation142_spill] sm:$0xff] %v4603_v54  ;;  %5749 = vst [vmem:[#allocation143_spill] sm:$0xff] %v4605_v39 }
 0x23f   : > { %1895 = vrot.lane.b32.xlu1 %v4045_v15, %s3167_s22  ;;  %1833 = vrot.lane.b32.xlu0 %v5750_v42, %s3166_s17 }
 0x241   : > { %v4611_v14 = vpop.permute.xlu1 %1516  ;;  %v4613_v62 = vpop.permute.xlu0 %1514 }
 0x242   : > { %5751 = vst [vmem:[#allocation49_spill] sm:$0xff] %v4611_v14  ;;  %5752 = vst [vmem:[#allocation144_spill] sm:$0xff] %v4613_v62  ;;  %v5757_v62 = vld [vmem:[#allocation71_spill] sm:$0xff] }
 0x243   : > { %1544 = vrot.lane.b32.xlu1 %v5750_v42, %s3163_s28  ;;  %1927 = vrot.lane.b32.xlu0 %v4149_v20, %s3167_s22  ;;  %v5758_v42 = vld [vmem:[#allocation60_spill] sm:$0xff] }
 0x245   : > { %v4619_v11 = vpop.permute.xlu1 %1520  ;;  %v4621_v58 = vpop.permute.xlu0 %1518 }
 0x246   : > { %5753 = vst [vmem:[#allocation145_spill] sm:$0xff] %v4619_v11  ;;  %5754 = vst [vmem:[#allocation146_spill] sm:$0xff] %v4621_v58  ;;  %v5759_v58 = vld [vmem:[#allocation52_spill] sm:$0xff] }
 0x247   : > { %1643 = vrot.lane.b32.xlu1 %v4149_v20, %s3164_s18  ;;  %1611 = vrot.lane.b32.xlu0 %v4045_v15, %s3164_s18 }
 0x249   : > { %v4627_v7 = vpop.permute.xlu1 %1524  ;;  %v4629_v14 = vpop.permute.xlu0 %1522 }
 0x24a   : > { %5755 = vst [vmem:[#allocation147_spill] sm:$0xff] %v4627_v7  ;;  %5756 = vst [vmem:[#allocation148_spill] sm:$0xff] %v4629_v14 }
 0x24b   : > { %1929 = vrot.lane.b32.xlu1 %v5757_v62, %s3167_s22  ;;  %1897 = vrot.lane.b32.xlu0 %v5758_v42, %s3167_s22 }
 0x24d   : > { %v4635_v2 = vpop.permute.xlu1 %1532  ;;  %v1531_v11 = vpop.permute.xlu0 %1530 }
 0x24f   : > { %1645 = vrot.lane.b32.xlu1 %v5757_v62, %s3164_s18  ;;  %1613 = vrot.lane.b32.xlu0 %v5758_v42, %s3164_s18 }
 0x251   : > { %v1632_v15 = vpop.permute.xlu1 %1631  ;;  %v1600_v20 = vpop.permute.xlu0 %1599 }
 0x253   : > { %1739 = vrot.lane.b32.xlu1 %v3933_v51, %s3165_s29  ;;  %1707 = vrot.lane.b32.xlu0 %v3669_v49, %s3165_s29  ;;  %v2992_v51 = vunpack.i.l.bf16 %v4175_v37 }
 0x255   : > { %v4645_v7 = vpop.permute.xlu1 %1633  ;;  %v4647_v14 = vpop.permute.xlu0 %1601  ;;  %v1984_v10 = vsel %vm1983_vm4, %v5761_v44, %v2992_v51  ;;  %v2000_v44 = vsel %vm1983_vm4, %v3782_v26, %v4253_v31 }
 0x257   : > { %1741 = vrot.lane.b32.xlu1 %v3922_v38, %s3165_s29  ;;  %1709 = vrot.lane.b32.xlu0 %v3650_v41, %s3165_s29  ;;  %v5760_v38 = vld [vmem:[#allocation74_spill] sm:$0xff] }
 0x258   : > { %v2997_v41 = vunpack.i.l.bf16 %v5760_v38 }
 0x259   : > { %v1728_v62 = vpop.permute.xlu1 %1727  ;;  %v1696_v42 = vpop.permute.xlu0 %1695 }
 0x25b   : > { %1835 = vrot.lane.b32.xlu1 %v5759_v58, %s3166_s17  ;;  %1803 = vrot.lane.b32.xlu0 %v5699_v33, %s3166_s17 }
 0x25d   : > { %v4658_v49 = vpop.permute.xlu1 %1729  ;;  %v4660_v54 = vpop.permute.xlu0 %1697 }
 0x25f   : > { %1805 = vrot.lane.b32.xlu1 %v3707_v32, %s3166_s17  ;;  %1546 = vrot.lane.b32.xlu0 %v5759_v58, %s3163_s28  ;;  %v2017_v32 = vsel %vm2016_vm5, %v1984_v10, %v2997_v41  ;;  %v5764_v41 = vld [vmem:[#allocation72_spill] sm:$0xff] }
 0x260   : > { %v2050_v58 = vsel %vm2049_vm6, %v2017_v32, %v4453_v19  ;;  %v2033_v19 = vsel %vm2016_vm5, %v2000_v44, %v4389_v53 }
 0x261   : > { %v1824_v33 = vpop.permute.xlu1 %1823  ;;  %v1792_v39 = vpop.permute.xlu0 %1791  ;;  %v2083_v51 = vsel %vm2082_vm7, %v2050_v58, %v4581_v1  ;;  %v2993_v1 = vunpack.i.h.bf16 %v4175_v37  ;;  %v2066_v32 = vsel %vm2049_vm6, %v2033_v19, %v4517_v3  ;;  %v2998_v37 = vunpack.i.h.bf16 %v5760_v38  ;;  %v5766_v38 = vld [vmem:[#allocation73_spill] sm:$0xff] }
 0x262   : > { %v2116_v21 = vsel %vm2115_vm8, %v2083_v51, %v1600_v20 }
 0x263   : > { %1899 = vrot.lane.b32.xlu1 %v5762_v27, %s3167_s22  ;;  %1837 = vrot.lane.b32.xlu0 %v5763_v0, %s3166_s17  ;;  %v2149_v10 = vsel %vm2148_vm9, %v2116_v21, %v1696_v42 }
 0x264   : > { %v2182_v31 = vsel %vm2181_vm10, %v2149_v10, %v1792_v39  ;;  %v5765_v39 = vld [vmem:[#allocation11_spill] sm:$0xff] }
 0x265   : > { %v1794_v45 = vpop.permute.xlu1 %1793  ;;  %v4676_v60 = vpop.permute.xlu0 %1534  ;;  %v1985_v21 = vsel %vm1983_vm4, %v5765_v39, %v2993_v1 }
 0x266   : > { %v2018_v42 = vsel %vm2016_vm5, %v1985_v21, %v2998_v37 }
 0x267   : > { %1548 = vrot.lane.b32.xlu1 %v5763_v0, %s3163_s28  ;;  %1931 = vrot.lane.b32.xlu0 %v5764_v41, %s3167_s22  ;;  %v2099_v0 = vsel %vm2082_vm7, %v2066_v32, %v1531_v11 }
 0x268   : > { %v2132_v26 = vsel %vm2115_vm8, %v2099_v0, %v1632_v15  ;;  %v5768_v0 = vld [vmem:[#allocation56_spill] sm:$0xff] }
 0x269   : > { %v1888_v20 = vpop.permute.xlu1 %1887  ;;  %v1826_v58 = vpop.permute.xlu0 %1825  ;;  %v2165_v53 = vsel %vm2148_vm9, %v2132_v26, %v1728_v62  ;;  %v5767_v26 = vld [vmem:[#allocation62_spill] sm:$0xff] }
 0x26a   : > { %v2215_v51 = vsel %vm2214_vm11, %v2182_v31, %v1888_v20  ;;  %v2198_v44 = vsel %vm2181_vm10, %v2165_v53, %v1824_v33  ;;  %v2051_v33 = vsel %vm2049_vm6, %v2018_v42, %v4451_v17 }
 0x26b   : > { %1647 = vrot.lane.b32.xlu1 %v5764_v41, %s3164_s18  ;;  %1615 = vrot.lane.b32.xlu0 %v5762_v27, %s3164_s18  ;;  %v2001_v27 = vsel %vm1983_vm4, %v3757_v50, %v4255_v4  ;;  %v2084_v10 = vsel %vm2082_vm7, %v2051_v33, %v4579_v63 }
 0x26c   : > { %2845 = vmatprep.mubr.msk.f32.mxu0 %vm2259_vm12, %v2215_v51  ;;  %v2034_v62 = vsel %vm2016_vm5, %v2001_v27, %v4387_v29  ;;  %v2117_v32 = vsel %vm2115_vm8, %v2084_v10, %v4647_v14 }
 0x26d   : > { %v4708_v3 = vpop.permute.xlu1 %1536  ;;  %v1920_v11 = vpop.permute.xlu0 %1919  ;;  %v2067_v41 = vsel %vm2049_vm6, %v2034_v62, %v4515_v36  ;;  %v2150_v63 = vsel %vm2148_vm9, %v2117_v32, %v4660_v54  ;;  %v5772_v32 = vld [vmem:[#allocation77_spill] sm:$0xff] }
 0x26e   : > { %v2231_v15 = vsel %vm2214_vm11, %v2198_v44, %v1920_v11  ;;  %v2100_v1 = vsel %vm2082_vm7, %v2067_v41, %v4635_v2  ;;  %v2183_v2 = vsel %vm2181_vm10, %v2150_v63, %v1794_v45  ;;  %v1986_v44 = vsel %vm1983_vm4, %v3536_v8, %v4191_v59  ;;  %v5769_v11 = vld [vmem:[#allocation63_spill] sm:$0xff]  ;;  %v5774_v63 = vld [vmem:[#allocation92_spill] sm:$0xff] }
 0x26f   : > { %1933 = vrot.lane.b32.xlu1 %v5766_v38, %s3167_s22  ;;  %1901 = vrot.lane.b32.xlu0 %v5767_v26, %s3167_s22  ;;  %v2133_v29 = vsel %vm2115_vm8, %v2100_v1, %v4645_v7  ;;  %v2002_v8 = vsel %vm1983_vm4, %v3811_v30, %v4261_v56 }
 0x270   : > { %2869 = vmatprep.mubr.msk.f32.mxu1 %vm2259_vm12, %v2231_v15  ;;  %v2166_v17 = vsel %vm2148_vm9, %v2133_v29, %v4658_v49  ;;  %v5770_v15 = vld [vmem:[#allocation55_spill] sm:$0xff] }
 0x271   : > { %v1636_v4 = vpop.permute.xlu1 %1635  ;;  %v1604_v19 = vpop.permute.xlu0 %1603  ;;  %v2199_v36 = vsel %vm2181_vm10, %v2166_v17, %v1826_v58  ;;  %v5773_v17 = vld [vmem:[#allocation15_spill] sm:$0xff] }
 0x273   : > { %1649 = vrot.lane.b32.xlu1 %v5766_v38, %s3164_s18  ;;  %1617 = vrot.lane.b32.xlu0 %v5767_v26, %s3164_s18 }
 0x275   : > { %v1922_v7 = vpop.permute.xlu1 %1921  ;;  %v1890_v31 = vpop.permute.xlu0 %1889 }
 0x276   : > { %v2232_v14 = vsel %vm2214_vm11, %v2199_v36, %v1922_v7  ;;  %v2216_v20 = vsel %vm2214_vm11, %v2183_v2, %v1890_v31  ;;  %v5775_v2 = vld [vmem:[#allocation34_spill] sm:$0xff]  ;;  %v5776_v7 = vld [vmem:[#allocation76_spill] sm:$0xff] }
 0x277   : > { %1743 = vrot.lane.b32.xlu1 %v3955_v6, %s3165_s29  ;;  %1711 = vrot.lane.b32.xlu0 %v3704_v13, %s3165_s29  ;;  %v2003_v36 = vsel %vm1983_vm4, %v5775_v2, %v5774_v63  ;;  %v5777_v31 = vld [vmem:[#allocation64_spill] sm:$0xff]  ;;  %v5789_v63 = vld [vmem:[#allocation93_spill] sm:$0xff] }
 0x278   : > { %2846 = vmatmul.mubr.msk.f32.vlgmr.msra.gmra.mxu0 %vm2259_vm12, %v2216_v20  ;;  %2870 = vmatmul.mubr.msk.f32.vlgmr.msra.gmra.mxu1 %vm2259_vm12, %v2232_v14  ;;  %v5778_v14 = vld [vmem:[#allocation105_spill] sm:$0xff] }
 0x279   : > { %v1638_v49 = vpop.permute.xlu1 %1637  ;;  %v1606_v54 = vpop.permute.xlu0 %1605 }
 0x27b   : > { %1745 = vrot.lane.b32.xlu1 %v3948_v57, %s3165_s29  ;;  %1713 = vrot.lane.b32.xlu0 %v3684_v43, %s3165_s29 }
 0x27d   : > { %v1732_v45 = vpop.permute.xlu1 %1731  ;;  %v1700_v58 = vpop.permute.xlu0 %1699 }
 0x27f   : > { %1839 = vrot.lane.b32.xlu1 %v5768_v0, %s3166_s17  ;;  %1807 = vrot.lane.b32.xlu0 %v5701_v24, %s3166_s17  ;;  %v2019_v24 = vsel %vm2016_vm5, %v1986_v44, %v4321_v22  ;;  %v5771_v22 = vld [vmem:[#allocation75_spill] sm:$0xff] }
 0x281   : > { %v1734_v51 = vpop.permute.xlu1 %1733  ;;  %v1702_v37 = vpop.permute.xlu0 %1701 }
 0x283   : > { %1809 = vrot.lane.b32.xlu1 %v5700_v40, %s3166_s17  ;;  %1550 = vrot.lane.b32.xlu0 %v5768_v0, %s3163_s28  ;;  %v2052_v40 = vsel %vm2049_vm6, %v2019_v24, %v4461_v9  ;;  %v2035_v9 = vsel %vm2016_vm5, %v2002_v8, %v4397_v23 }
 0x284   : > { %v2085_v26 = vsel %vm2082_vm7, %v2052_v40, %v4589_v47  ;;  %v2068_v47 = vsel %vm2049_vm6, %v2035_v9, %v4525_v46  ;;  %v5783_v9 = vld [vmem:[#allocation27_spill] sm:$0xff] }
 0x285   : > { %v1828_v53 = vpop.permute.xlu1 %1827  ;;  %v1796_v21 = vpop.permute.xlu0 %1795  ;;  %v2118_v59 = vsel %vm2115_vm8, %v2085_v26, %v1604_v19  ;;  %v2101_v41 = vsel %vm2082_vm7, %v2068_v47, %v4676_v60 }
 0x286   : > { %v2151_v62 = vsel %vm2148_vm9, %v2118_v59, %v1700_v58  ;;  %v2134_v10 = vsel %vm2115_vm8, %v2101_v41, %v1636_v4  ;;  %v1987_v4 = vsel %vm1983_vm4, %v5773_v17, %v5772_v32  ;;  %v5780_v59 = vld [vmem:[#allocation54_spill] sm:$0xff] }
 0x287   : > { %1903 = vrot.lane.b32.xlu1 %v5769_v11, %s3167_s22  ;;  %1841 = vrot.lane.b32.xlu0 %v5770_v15, %s3166_s17  ;;  %v2184_v42 = vsel %vm2181_vm10, %v2151_v62, %v1796_v21  ;;  %v2167_v23 = vsel %vm2148_vm9, %v2134_v10, %v1732_v45  ;;  %v2020_v20 = vsel %vm2016_vm5, %v1987_v4, %v5778_v14  ;;  %v5779_v45 = vld [vmem:[#allocation26_spill] sm:$0xff]  ;;  %v5785_v10 = vld [vmem:[#allocation80_spill] sm:$0xff] }
 0x288   : > { %v2200_v46 = vsel %vm2181_vm10, %v2167_v23, %v1828_v53  ;;  %v2036_v58 = vsel %vm2016_vm5, %v2003_v36, %v5779_v45  ;;  %v2053_v0 = vsel %vm2049_vm6, %v2020_v20, %v4459_v61  ;;  %v1988_v23 = vsel %vm1983_vm4, %v3559_v28, %v5785_v10 }
 0x289   : > { %v1798_v27 = vpop.permute.xlu1 %1797  ;;  %v4775_v38 = vpop.permute.xlu0 %1538  ;;  %v2069_v53 = vsel %vm2049_vm6, %v2036_v58, %v4523_v55  ;;  %v2004_v28 = vsel %vm1983_vm4, %v3843_v35, %v5789_v63  ;;  %v5801_v63 = vld [vmem:[#allocation109_spill] sm:$0xff] }
 0x28b   : > { %1552 = vrot.lane.b32.xlu1 %v5770_v15, %s3163_s28  ;;  %1935 = vrot.lane.b32.xlu0 %v5771_v22, %s3167_s22  ;;  %v2102_v15 = vsel %vm2082_vm7, %v2069_v53, %v4708_v3 }
 0x28c   : > { %v2135_v24 = vsel %vm2115_vm8, %v2102_v15, %v1638_v49 }
 0x28d   : > { %v1892_v33 = vpop.permute.xlu1 %1891  ;;  %v1830_v56 = vpop.permute.xlu0 %1829  ;;  %v2168_v61 = vsel %vm2148_vm9, %v2135_v24, %v1734_v51  ;;  %v5792_v24 = vld [vmem:[#allocation81_spill] sm:$0xff] }
 0x28e   : > { %v2217_v19 = vsel %vm2214_vm11, %v2184_v42, %v1892_v33  ;;  %v5784_v42 = vld [vmem:[#allocation58_spill] sm:$0xff] }
 0x28f   : > { %1651 = vrot.lane.b32.xlu1 %v5771_v22, %s3164_s18  ;;  %1619 = vrot.lane.b32.xlu0 %v5769_v11, %s3164_s18  ;;  %v2086_v11 = vsel %vm2082_vm7, %v2053_v0, %v4587_v16  ;;  %v2201_v16 = vsel %vm2181_vm10, %v2168_v61, %v1830_v56  ;;  %v5781_v22 = vld [vmem:[#allocation28_spill] sm:$0xff] }
 0x290   : > { %2848 = vmatprep.mubr.msk.f32.mxu0 %vm2259_vm12, %v2217_v19  ;;  %v2119_v40 = vsel %vm2115_vm8, %v2086_v11, %v1606_v54 }
 0x291   : > { %v4804_v1 = vpop.permute.xlu1 %1540  ;;  %v1924_v29 = vpop.permute.xlu0 %1923  ;;  %v2152_v55 = vsel %vm2148_vm9, %v2119_v40, %v1702_v37  ;;  %v5793_v40 = vld [vmem:[#allocation94_spill] sm:$0xff] }
 0x292   : > { %v2233_v60 = vsel %vm2214_vm11, %v2200_v46, %v1924_v29  ;;  %v2185_v26 = vsel %vm2181_vm10, %v2152_v55, %v1798_v27  ;;  %v5782_v27 = vld [vmem:[#allocation53_spill] sm:$0xff]  ;;  %v2005_v61 = vsel %vm1983_vm4, %v3827_v12, %v5793_v40  ;;  %v5794_v55 = vld [vmem:[#allocation79_spill] sm:$0xff]  ;;  %v1594_v40 = vrot.slane %v5801_v63, 2 }
 0x293   : > { %1937 = vrot.lane.b32.xlu1 %v5776_v7, %s3167_s22  ;;  %1905 = vrot.lane.b32.xlu0 %v5777_v31, %s3167_s22  ;;  %v5786_v46 = vld [vmem:[#allocation65_spill] sm:$0xff] }
 0x294   : > { %2872 = vmatprep.mubr.msk.f32.mxu1 %vm2259_vm12, %v2233_v60  ;;  %v5787_v29 = vld [vmem:[#allocation57_spill] sm:$0xff] }
 0x295   : > { %v1640_v21 = vpop.permute.xlu1 %1639  ;;  %v1608_v44 = vpop.permute.xlu0 %1607 }
 0x297   : > { %1653 = vrot.lane.b32.xlu1 %v5776_v7, %s3164_s18  ;;  %1621 = vrot.lane.b32.xlu0 %v5777_v31, %s3164_s18  ;;  %v5790_v7 = vld [vmem:[#allocation78_spill] sm:$0xff] }
 0x298   : > { %v5791_v31 = vld [vmem:[#allocation30_spill] sm:$0xff] }
 0x299   : > { %v1926_v8 = vpop.permute.xlu1 %1925  ;;  %v1894_v3 = vpop.permute.xlu0 %1893 }
 0x29a   : > { %v2234_v49 = vsel %vm2214_vm11, %v2201_v16, %v1926_v8  ;;  %v2218_v54 = vsel %vm2214_vm11, %v2185_v26, %v1894_v3  ;;  %v5795_v26 = vld [vmem:[#allocation66_spill] sm:$0xff]  ;;  %v5796_v16 = vld [vmem:[#allocation107_spill] sm:$0xff]  ;;  %v5797_v3 = vld [vmem:[#allocation29_spill] sm:$0xff] }
 0x29b   : > { %1747 = vrot.lane.b32.xlu1 %v5780_v59, %s3165_s29  ;;  %1715 = vrot.lane.b32.xlu0 %v5781_v22, %s3165_s29 }
 0x29c   : > { %2849 = vmatmul.mubr.msk.f32.gmra.mxu0 %vm2259_vm12, %v2218_v54  ;;  %2873 = vmatmul.mubr.msk.f32.gmra.mxu1 %vm2259_vm12, %v2234_v49  ;;  %v2038_v49 = vsel %vm2016_vm5, %v2005_v61, %v5797_v3  ;;  %v5798_v54 = vld [vmem:[#allocation43_spill] sm:$0xff]  ;;  %v5809_v61 = vld [vmem:[#allocation112_spill] sm:$0xff] }
 0x29d   : > { %v1642_v51 = vpop.permute.xlu1 %1641  ;;  %v1610_v37 = vpop.permute.xlu0 %1609 }
 0x29f   : > { %1749 = vrot.lane.b32.xlu1 %v5782_v27, %s3165_s29  ;;  %1717 = vrot.lane.b32.xlu0 %v5783_v9, %s3165_s29 }
 0x2a1   : > { %v1736_v62 = vpop.permute.xlu1 %1735  ;;  %v1704_v47 = vpop.permute.xlu0 %1703 }
 0x2a3   : > { %1843 = vrot.lane.b32.xlu1 %v5784_v42, %s3166_s17  ;;  %1811 = vrot.lane.b32.xlu0 %v5704_v34, %s3166_s17  ;;  %v5788_v34 = vld [vmem:[#allocation108_spill] sm:$0xff] }
 0x2a4   : > { %v2021_v60 = vsel %vm2016_vm5, %v1988_v23, %v5788_v34 }
 0x2a5   : > { %v1738_v33 = vpop.permute.xlu1 %1737  ;;  %v1706_v56 = vpop.permute.xlu0 %1705 }
 0x2a7   : > { %1813 = vrot.lane.b32.xlu1 %v5703_v25, %s3166_s17  ;;  %1554 = vrot.lane.b32.xlu0 %v5784_v42, %s3163_s28  ;;  %v2054_v25 = vsel %vm2049_vm6, %v2021_v60, %v4469_v18  ;;  %v2037_v18 = vsel %vm2016_vm5, %v2004_v28, %v5791_v31  ;;  %v5802_v28 = vld [vmem:[#allocation31_spill] sm:$0xff] }
 0x2a8   : > { %v2087_v4 = vsel %vm2082_vm7, %v2054_v25, %v4597_v52  ;;  %v2070_v52 = vsel %vm2049_vm6, %v2037_v18, %v4533_v5 }
 0x2a9   : > { %v1832_v41 = vpop.permute.xlu1 %1831  ;;  %v1800_v19 = vpop.permute.xlu0 %1799  ;;  %v2120_v36 = vsel %vm2115_vm8, %v2087_v4, %v1608_v44  ;;  %v2103_v58 = vsel %vm2082_vm7, %v2070_v52, %v4775_v38  ;;  %v5804_v52 = vld [vmem:[#allocation36_spill] sm:$0xff] }
 0x2aa   : > { %v2153_v14 = vsel %vm2148_vm9, %v2120_v36, %v1704_v47  ;;  %v2136_v53 = vsel %vm2115_vm8, %v2103_v58, %v1640_v21  ;;  %v1989_v21 = vsel %vm1983_vm4, %v3550_v48, %v5792_v24 }
 0x2ab   : > { %1907 = vrot.lane.b32.xlu1 %v5786_v46, %s3167_s22  ;;  %1845 = vrot.lane.b32.xlu0 %v5787_v29, %s3166_s17  ;;  %v2186_v20 = vsel %vm2181_vm10, %v2153_v14, %v1800_v19  ;;  %v2169_v44 = vsel %vm2148_vm9, %v2136_v53, %v1736_v62  ;;  %v2022_v8 = vsel %vm2016_vm5, %v1989_v21, %v5796_v16  ;;  %v5799_v62 = vld [vmem:[#allocation46_spill] sm:$0xff]  ;;  %v5808_v21 = vld [vmem:[#allocation35_spill] sm:$0xff] }
 0x2ac   : > { %v2202_v5 = vsel %vm2181_vm10, %v2169_v44, %v1832_v41  ;;  %v2055_v48 = vsel %vm2049_vm6, %v2022_v8, %v5798_v54  ;;  %v2071_v12 = vsel %vm2049_vm6, %v2038_v49, %v5799_v62  ;;  %v5800_v41 = vld [vmem:[#allocation50_spill] sm:$0xff]  ;;  %v5811_v49 = vld [vmem:[#allocation143_spill] sm:$0xff] }
 0x2ad   : > { %v1802_v32 = vpop.permute.xlu1 %1801  ;;  %v4871_v17 = vpop.permute.xlu0 %1542  ;;  %v2088_v19 = vsel %vm2082_vm7, %v2055_v48, %v5800_v41  ;;  %v2104_v10 = vsel %vm2082_vm7, %v2071_v12, %v4804_v1  ;;  %v5812_v62 = vld [vmem:[#allocation95_spill] sm:$0xff]  ;;  %v5813_v12 = vld [vmem:[#allocation40_spill] sm:$0xff] }
 0x2ae   : > { %v2137_v23 = vsel %vm2115_vm8, %v2104_v10, %v1642_v51  ;;  %v2006_v41 = vsel %vm1983_vm4, %v5813_v12, %v5812_v62  ;;  %v5814_v10 = vld [vmem:[#allocation67_spill] sm:$0xff] }
 0x2af   : > { %1556 = vrot.lane.b32.xlu1 %v5787_v29, %s3163_s28  ;;  %1939 = vrot.lane.b32.xlu0 %v5790_v7, %s3167_s22  ;;  %v2170_v29 = vsel %vm2148_vm9, %v2137_v23, %v1738_v33  ;;  %v5815_v23 = vld [vmem:[#allocation33_spill] sm:$0xff] }
 0x2b1   : > { %v1896_v45 = vpop.permute.xlu1 %1895  ;;  %v1834_v35 = vpop.permute.xlu0 %1833 }
 0x2b2   : > { %v2219_v0 = vsel %vm2214_vm11, %v2186_v20, %v1896_v45  ;;  %v2203_v25 = vsel %vm2181_vm10, %v2170_v29, %v1834_v35  ;;  %v5805_v20 = vld [vmem:[#allocation106_spill] sm:$0xff] }
 0x2b3   : > { %1655 = vrot.lane.b32.xlu1 %v5790_v7, %s3164_s18  ;;  %1623 = vrot.lane.b32.xlu0 %v5786_v46, %s3164_s18  ;;  %v2121_v46 = vsel %vm2115_vm8, %v2088_v19, %v1610_v37  ;;  %v1493_v7 = vrot.slane %v5801_v63, 1  ;;  %v1008_v45 = vsel %vm875_vm0, %v5805_v20, 0.0  ;;  %v5820_v20 = vld [vmem:[#allocation39_spill] sm:$0xff] }
 0x2b4   : > { %2851 = vmatprep.mubr.msk.f32.mxu0 %vm2259_vm12, %v2219_v0  ;;  %v2154_v34 = vsel %vm2148_vm9, %v2121_v46, %v1706_v56  ;;  %v1496_v0 = vrot.slane %v1008_v45, 1  ;;  %v2039_v46 = vsel %vm2016_vm5, %v2006_v41, %v5815_v23 }
 0x2b5   : > { %v4900_v11 = vpop.permute.xlu1 %1544  ;;  %v1928_v15 = vpop.permute.xlu0 %1927  ;;  %v2187_v60 = vsel %vm2181_vm10, %v2154_v34, %v1802_v32  ;;  %v5803_v32 = vld [vmem:[#allocation110_spill] sm:$0xff] }
 0x2b6   : > { %v2235_v38 = vsel %vm2214_vm11, %v2202_v5, %v1928_v15  ;;  %v1494_v36 = vrot.slane %v5803_v32, 1  ;;  %v1595_v44 = vrot.slane %v5803_v32, 2  ;;  %v5806_v15 = vld [vmem:[#allocation82_spill] sm:$0xff] }
 0x2b7   : > { %1941 = vrot.lane.b32.xlu1 %v5794_v55, %s3167_s22  ;;  %1909 = vrot.lane.b32.xlu0 %v5795_v26, %s3167_s22  ;;  %v5816_v34 = vld [vmem:[#allocation134_spill] sm:$0xff] }
 0x2b8   : > { %2875 = vmatprep.mubr.msk.f32.mxu1 %vm2259_vm12, %v2235_v38  ;;  %v1495_v14 = vsel %vm1041_vm2, %v1493_v7, %v1494_v36  ;;  %v1497_v5 = vsel %vm1041_vm2, %v1494_v36, %v1496_v0  ;;  %v5807_v38 = vld [vmem:[#allocation17_spill] sm:$0xff]  ;;  %v1596_v48 = vsel %vm1218_vm1, %v1594_v40, %v1595_v44  ;;  %v1597_v7 = vrot.slane %v1008_v45, 2  ;;  %v5823_v45 = vld [vmem:[#allocation42_spill] sm:$0xff] }
 0x2b9   : > { %v4922_v47 = vpop.permute.xlu1 %1643  ;;  %v1612_v42 = vpop.permute.xlu0 %1611  ;;  %v1990_v24 = vsel %vm1983_vm4, %v5807_v38, %v5806_v15  ;;  %v5824_v38 = vld [vmem:[#allocation45_spill] sm:$0xff] }
 0x2bb   : > { %1657 = vrot.lane.b32.xlu1 %v5794_v55, %s3164_s18  ;;  %1625 = vrot.lane.b32.xlu0 %v5795_v26, %s3164_s18  ;;  %v2023_v55 = vsel %vm2016_vm5, %v1990_v24, %v5809_v61  ;;  %v5810_v26 = vld [vmem:[#allocation125_spill] sm:$0xff]  ;;  %v5825_v61 = vld [vmem:[#allocation142_spill] sm:$0xff] }
 0x2bc   : > { %v2056_v16 = vsel %vm2049_vm6, %v2023_v55, %v5810_v26 }
 0x2bd   : > { %v1930_v4 = vpop.permute.xlu1 %1929  ;;  %v1898_v1 = vpop.permute.xlu0 %1897  ;;  %v2089_v54 = vsel %vm2082_vm7, %v2056_v16, %v5811_v49  ;;  %v1598_v16 = vsel %vm1218_vm1, %v1595_v44, %v1597_v7 }
 0x2be   : > { %v2236_v51 = vsel %vm2214_vm11, %v2203_v25, %v1930_v4  ;;  %v2220_v37 = vsel %vm2214_vm11, %v2187_v60, %v1898_v1  ;;  %v2122_v19 = vsel %vm2115_vm8, %v2089_v54, %v1612_v42  ;;  %v2072_v60 = vsel %vm2049_vm6, %v2039_v46, %v5816_v34 }
 0x2bf   : > { %1751 = vrot.lane.b32.xlu1 %v5801_v63, %s3165_s29  ;;  %1719 = vrot.lane.b32.xlu0 %v5802_v28, %s3165_s29  ;;  %v2105_v42 = vsel %vm2082_vm7, %v2072_v60, %v4871_v17  ;;  %v5829_v60 = vld [vmem:[#allocation37_spill] sm:$0xff] }
 0x2c0   : > { %2852 = vmatmul.mubr.msk.f32.gmra.mxu0 %vm2259_vm12, %v2220_v37  ;;  %2876 = vmatmul.mubr.msk.f32.gmra.mxu1 %vm2259_vm12, %v2236_v51  ;;  %v2138_v37 = vsel %vm2115_vm8, %v2105_v42, %v4922_v47  ;;  %v5831_v42 = vld [vmem:[#allocation84_spill] sm:$0xff] }
 0x2c1   : > { %v4946_v33 = vpop.permute.xlu1 %1645  ;;  %v4948_v56 = vpop.permute.xlu0 %1613 }
 0x2c3   : > { %1753 = vrot.lane.b32.xlu1 %v5803_v32, %s3165_s29  ;;  %1721 = vrot.lane.b32.xlu0 %v3757_v50, %s3165_s29 }
 0x2c5   : > { %v1740_v31 = vpop.permute.xlu1 %1739  ;;  %v1708_v18 = vpop.permute.xlu0 %1707 }
 0x2c6   : > { %v2155_v29 = vsel %vm2148_vm9, %v2122_v19, %v1708_v18  ;;  %v2171_v63 = vsel %vm2148_vm9, %v2138_v37, %v1740_v31  ;;  %v5817_v18 = vld [vmem:[#allocation83_spill] sm:$0xff]  ;;  %v5833_v37 = vld [vmem:[#allocation13_spill] sm:$0xff] }
 0x2c7   : > { %1847 = vrot.lane.b32.xlu1 %v1495_v14, %s3166_s17  ;;  %1815 = vrot.lane.b32.xlu0 %v5804_v52, %s3166_s17  ;;  %v5821_v31 = vld [vmem:[#allocation111_spill] sm:$0xff] }
 0x2c9   : > { %v1742_v35 = vpop.permute.xlu1 %1741  ;;  %v1710_v58 = vpop.permute.xlu0 %1709 }
 0x2cb   : > { %1558 = vrot.lane.b32.xlu1 %v1495_v14, %s3163_s28  ;;  %1526 = vrot.lane.b32.xlu0 %v5804_v52, %s3163_s28  ;;  %v5818_v14 = vld [vmem:[#allocation16_spill] sm:$0xff] }
 0x2cc   : > { %v1991_v47 = vsel %vm1983_vm4, %v5818_v14, %v5817_v18  ;;  %v5819_v52 = vld [vmem:[#allocation96_spill] sm:$0xff] }
 0x2cd   : > { %v1836_v50 = vpop.permute.xlu1 %1835  ;;  %v1804_v53 = vpop.permute.xlu0 %1803  ;;  %v2007_v0 = vsel %vm1983_vm4, %v5820_v20, %v5819_v52  ;;  %v5837_v14 = vld [vmem:[#allocation144_spill] sm:$0xff]  ;;  %v5838_v52 = vld [vmem:[#allocation97_spill] sm:$0xff] }
 0x2ce   : > { %v2188_v25 = vsel %vm2181_vm10, %v2155_v29, %v1804_v53  ;;  %v2204_v28 = vsel %vm2181_vm10, %v2171_v63, %v1836_v50  ;;  %v2024_v50 = vsel %vm2016_vm5, %v1991_v47, %v5821_v31  ;;  %v5822_v53 = vld [vmem:[#allocation32_spill] sm:$0xff]  ;;  %v5828_v29 = vld [vmem:[#allocation38_spill] sm:$0xff]  ;;  %v5834_v63 = vld [vmem:[#allocation69_spill] sm:$0xff] }
 0x2cf   : > { %1849 = vrot.lane.b32.xlu1 %v1497_v5, %s3166_s17  ;;  %1817 = vrot.lane.b32.xlu0 %v5808_v21, %s3166_s17  ;;  %v2057_v15 = vsel %vm2049_vm6, %v2024_v50, %v5823_v45  ;;  %v5839_v20 = vld [vmem:[#allocation44_spill] sm:$0xff]  ;;  %v5840_v50 = vld [vmem:[#allocation70_spill] sm:$0xff] }
 0x2d0   : > { %v2090_v55 = vsel %vm2082_vm7, %v2057_v15, %v5825_v61  ;;  %v5842_v15 = vld [vmem:[#allocation136_spill] sm:$0xff] }
 0x2d1   : > { %v1806_v8 = vpop.permute.xlu1 %1805  ;;  %v4978_v3 = vpop.permute.xlu0 %1546  ;;  %v2123_v54 = vsel %vm2115_vm8, %v2090_v55, %v4948_v56  ;;  %v5827_v56 = vld [vmem:[#allocation12_spill] sm:$0xff] }
 0x2d2   : > { %v2156_v12 = vsel %vm2148_vm9, %v2123_v54, %v1710_v58 }
 0x2d3   : > { %1943 = vrot.lane.b32.xlu1 %v1596_v48, %s3167_s22  ;;  %1911 = vrot.lane.b32.xlu0 %v5814_v10, %s3167_s22  ;;  %v2189_v41 = vsel %vm2181_vm10, %v2156_v12, %v1806_v8 }
 0x2d5   : > { %v1900_v4 = vpop.permute.xlu1 %1899  ;;  %v1838_v1 = vpop.permute.xlu0 %1837 }
 0x2d6   : > { %v2221_v51 = vsel %vm2214_vm11, %v2188_v25, %v1900_v4  ;;  %v5830_v25 = vld [vmem:[#allocation14_spill] sm:$0xff] }
 0x2d7   : > { %1560 = vrot.lane.b32.xlu1 %v1497_v5, %s3163_s28  ;;  %1528 = vrot.lane.b32.xlu0 %v5808_v21, %s3163_s28  ;;  %v2040_v5 = vsel %vm2016_vm5, %v2007_v0, %v5822_v53  ;;  %v2008_v0 = vsel %vm1983_vm4, %v5839_v20, %v5838_v52  ;;  %v5841_v53 = vld [vmem:[#allocation118_spill] sm:$0xff]  ;;  %s3072_s28 = sshll.u32 %s3168_s20, 4  ;;  %s3073_s28 = int_to_ptr.vmem [resolvable:$false] %s3072_s28 }
 0x2d8   : > { %2854 = vmatprep.mubr.msk.f32.mxu0 %vm2259_vm12, %v2221_v51  ;;  %v2073_v24 = vsel %vm2049_vm6, %v2040_v5, %v5824_v38  ;;  %v2041_v5 = vsel %vm2016_vm5, %v2008_v0, %v5841_v53  ;;  %p3075_p10 = scmp.lt.s32.totalorder %s5393_s10, %s3073_s28 }
 0x2d9   : > { %v5007_v32 = vpop.permute.xlu1 %1548  ;;  %v1932_v36 = vpop.permute.xlu0 %1931  ;;  %v2106_v26 = vsel %vm2082_vm7, %v2073_v24, %v4900_v11  ;;  %v2074_v38 = vsel %vm2049_vm6, %v2041_v5, %v5842_v15  ;;  %v5854_v5 = vld [vmem:[#allocation18_spill] sm:$0xff]  ;;  %v5855_v15 = vld [vmem:[#allocation129_spill] sm:$0xff] }
 0x2da   : > { %v2237_v17 = vsel %vm2214_vm11, %v2204_v28, %v1932_v36  ;;  %v2139_v49 = vsel %vm2115_vm8, %v2106_v26, %v4946_v33  ;;  %v5836_v36 = vld [vmem:[#allocation127_spill] sm:$0xff]  ;;  %v2107_v26 = vsel %vm2082_vm7, %v2074_v38, %v4978_v3  ;;  %v5845_v3 = vld [vmem:[#allocation98_spill] sm:$0xff] }
 0x2db   : > { %1659 = vrot.lane.b32.xlu1 %v1596_v48, %s3164_s18  ;;  %1627 = vrot.lane.b32.xlu0 %v5814_v10, %s3164_s18  ;;  %v5826_v48 = vld [vmem:[#allocation68_spill] sm:$0xff]  ;;  %v2172_v62 = vsel %vm2148_vm9, %v2139_v49, %v1742_v35  ;;  %v2999_v35 = vpack.i.bf16 %v5765_v39, %v5827_v56  ;;  %v5848_v56 = vld [vmem:[#allocation117_spill] sm:$0xff] }
 0x2dc   : > { %2878 = vmatprep.mubr.msk.f32.mxu1 %vm2259_vm12, %v2237_v17  ;;  %v2205_v11 = vsel %vm2181_vm10, %v2172_v62, %v1838_v1 }
 0x2dd   : > { %v1648_v21 = vpop.permute.xlu1 %1647  ;;  %v1616_v40 = vpop.permute.xlu0 %1615 }
 0x2df   : > { %1945 = vrot.lane.b32.xlu1 %v1598_v16, %s3167_s22  ;;  %1913 = vrot.lane.b32.xlu0 %v5826_v48, %s3167_s22 }
 0x2e1   : > { %v1934_v44 = vpop.permute.xlu1 %1933  ;;  %v1902_v19 = vpop.permute.xlu0 %1901 }
 0x2e2   : > { %v2238_v33 = vsel %vm2214_vm11, %v2205_v11, %v1934_v44  ;;  %v2222_v10 = vsel %vm2214_vm11, %v2189_v41, %v1902_v19  ;;  %v5843_v41 = vld [vmem:[#allocation85_spill] sm:$0xff]  ;;  %v5844_v11 = vld [vmem:[#allocation20_spill] sm:$0xff] }
 0x2e3   : > { %1661 = vrot.lane.b32.xlu1 %v1598_v16, %s3164_s18  ;;  %1629 = vrot.lane.b32.xlu0 %v5826_v48, %s3164_s18  ;;  %v2140_v16 = vsel %vm2115_vm8, %v2107_v26, %v1648_v21  ;;  %v1993_v44 = vsel %vm1983_vm4, %v5844_v11, %v5843_v41  ;;  %v5846_v19 = vld [vmem:[#allocation41_spill] sm:$0xff]  ;;  %v5860_v11 = vld [vmem:[#allocation138_spill] sm:$0xff]  ;;  %s3074_s18 = scalar_lea.vmem %s3073_s28, 8192 }
 0x2e4   : > { %2855 = vmatmul.mubr.msk.f32.gmra.mxu0 %vm2259_vm12, %v2222_v10  ;;  %2879 = vmatmul.mubr.msk.f32.gmra.mxu1 %vm2259_vm12, %v2238_v33  ;;  %v2009_v33 = vsel %vm1983_vm4, %v5846_v19, %v5845_v3  ;;  %v5847_v21 = vld [vmem:[#allocation113_spill] sm:$0xff]  ;;  %p3076_p12 = scmp.lt.s32.totalorder %s3074_s18, %s3068_s4 }
 0x2e5   : > { %v1650_v58 = vpop.permute.xlu1 %1649  ;;  %v1618_v8 = vpop.permute.xlu0 %1617  ;;  %v2026_v10 = vsel %vm2016_vm5, %v1993_v44, %v5847_v21 }
 0x2e6   : > { %p3077_p13 = por %p3076_p12, %p3075_p10 }
 0x2e7   : > { %3000 = vrot.lane.b32.xlu1 %v2999_v35, %s3165_s29  ;;  %1723 = vrot.lane.b32.xlu0 %v3811_v30, %s3165_s29  ;;  %v5832_v30 = vld [vmem:[#allocation21_spill] sm:$0xff]  ;;  %v2042_v35 = vsel %vm2016_vm5, %v2009_v33, %v5848_v56 }
 0x2e8   : > { %v1992_v51 = vsel %vm1983_vm4, %v5832_v30, %v5831_v42  ;;  %p3078_p0 = pnand %p3077_p13, %p3071_p9 }
 0x2e9   : > { %v1744_v23 = vpop.permute.xlu1 %1743  ;;  %v1712_v46 = vpop.permute.xlu0 %1711 }
 0x2ea   : > { %v2173_v49 = vsel %vm2148_vm9, %v2140_v16, %v1744_v23  ;;  %v5849_v23 = vld [vmem:[#allocation126_spill] sm:$0xff]  ;;  %v5858_v16 = vld [vmem:[#allocation48_spill] sm:$0xff] }
 0x2eb   : > { %1819 = vrot.lane.b32.xlu1 %v5828_v29, %s3166_s17  ;;  %1725 = vrot.lane.b32.xlu0 %v5775_v2, %s3165_s29  ;;  %v5835_v2 = vld [vmem:[#allocation114_spill] sm:$0xff]  ;;  %v5850_v29 = vld [vmem:[#allocation135_spill] sm:$0xff] }
 0x2ec   : > { %v2025_v28 = vsel %vm2016_vm5, %v1992_v51, %v5835_v2 }
 0x2ed   : > { %v1746_v39 = vpop.permute.xlu1 %1745  ;;  %v1714_v34 = vpop.permute.xlu0 %1713  ;;  %v2058_v17 = vsel %vm2049_vm6, %v2025_v28, %v5836_v36 }
 0x2ee   : > { %v2091_v47 = vsel %vm2082_vm7, %v2058_v17, %v5837_v14 }
 0x2ef   : > { %1821 = vrot.lane.b32.xlu1 %v5829_v60, %s3166_s17  ;;  %3005 = vrot.lane.b32.xlu0 %v5830_v25, %s3166_s17  ;;  %v2124_v31 = vsel %vm2115_vm8, %v2091_v47, %v1616_v40  ;;  %v2075_v60 = vsel %vm2049_vm6, %v2042_v35, %v5850_v29 }
 0x2f0   : > { %v2157_v45 = vsel %vm2148_vm9, %v2124_v31, %v1712_v46  ;;  %v2059_v46 = vsel %vm2049_vm6, %v2026_v10, %v5849_v23  ;;  %v2108_v30 = vsel %vm2082_vm7, %v2075_v60, %v5007_v32  ;;  %v5852_v31 = vld [vmem:[#allocation86_spill] sm:$0xff] }
 0x2f1   : > { %v1840_v4 = vpop.permute.xlu1 %1839  ;;  %v1808_v1 = vpop.permute.xlu0 %1807  ;;  %v2141_v51 = vsel %vm2115_vm8, %v2108_v30, %v1650_v58  ;;  %v5864_v30 = vld [vmem:[#allocation47_spill] sm:$0xff] }
 0x2f2   : > { %v2190_v24 = vsel %vm2181_vm10, %v2157_v45, %v1808_v1  ;;  %v2206_v54 = vsel %vm2181_vm10, %v2173_v49, %v1840_v4  ;;  %v5851_v1 = vld [vmem:[#allocation49_spill] sm:$0xff] }
 0x2f3   : > { %3010 = vrot.lane.b32.xlu1 %v5833_v37, %s3167_s22  ;;  %1915 = vrot.lane.b32.xlu0 %v5834_v63, %s3167_s22  ;;  %v2092_v42 = vsel %vm2082_vm7, %v2059_v46, %v5851_v1  ;;  %v2174_v63 = vsel %vm2148_vm9, %v2141_v51, %v1746_v39  ;;  %v5862_v1 = vld [vmem:[#allocation24_spill] sm:$0xff] }
 0x2f4   : > { %v2125_v37 = vsel %vm2115_vm8, %v2092_v42, %v1618_v8 }
 0x2f5   : > { %v1810_v7 = vpop.permute.xlu1 %1809  ;;  %v5075_v18 = vpop.permute.xlu0 %1550  ;;  %v2158_v2 = vsel %vm2148_vm9, %v2125_v37, %v1714_v34 }
 0x2f6   : > { %v2191_v28 = vsel %vm2181_vm10, %v2158_v2, %v1810_v7 }
 0x2f7   : > { %1917 = vrot.lane.b32.xlu0 %v5840_v50, %s3167_s22  ;;  %v5853_v50 = vld [vmem:[#allocation25_spill] sm:$0xff] }
 0x2f8   : > { %v1994_v53 = vsel %vm1983_vm4, %v5853_v50, %v5852_v31 }
 0x2f9   : > { %v1904_v61 = vpop.permute.xlu1 %1903  ;;  %v1842_v55 = vpop.permute.xlu0 %1841  ;;  %v2027_v45 = vsel %vm2016_vm5, %v1994_v53, %v5854_v5 }
 0x2fa   : > { %v2223_v40 = vsel %vm2214_vm11, %v2190_v24, %v1904_v61  ;;  %v2207_v36 = vsel %vm2181_vm10, %v2174_v63, %v1842_v55  ;;  %v2060_v38 = vsel %vm2049_vm6, %v2027_v45, %v5855_v15  ;;  %v5856_v55 = vld [vmem:[#allocation146_spill] sm:$0xff]  ;;  %v5866_v63 = vld [vmem:[#allocation119_spill] sm:$0xff] }
 0x2fb   : > { %2857 = vmatprep.mubr.msk.f32.mxu0 %vm2259_vm12, %v2223_v40  ;;  %v2093_v26 = vsel %vm2082_vm7, %v2060_v38, %v5856_v55  ;;  %v5857_v40 = vld [vmem:[#allocation99_spill] sm:$0xff] }
 0x2fc   : > { %v2010_v49 = vsel %vm1983_vm4, %v5858_v16, %v5857_v40  ;;  %v5197_v40 = vld [vmem:[%s5441_s2] ss:$0 sm:$0xff] }
 0x2fd   : > { %v5098_v48 = vpop.permute.xlu1 %1552  ;;  %v1936_v62 = vpop.permute.xlu0 %1935 }
 0x2fe   : > { %v2239_v12 = vsel %vm2214_vm11, %v2206_v54, %v1936_v62  ;;  %v5859_v62 = vld [vmem:[#allocation120_spill] sm:$0xff] }
 0x2ff   : > { %2881 = vmatprep.mubr.msk.f32.mxu1 %vm2259_vm12, %v2239_v12  ;;  %v2043_v12 = vsel %vm2016_vm5, %v2010_v49, %v5859_v62 }
 0x300   : > { %v2076_v44 = vsel %vm2049_vm6, %v2043_v12, %v5860_v11 }
 0x301   : > { %v1652_v25 = vpop.permute.xlu1 %1651  ;;  %v1620_v4 = vpop.permute.xlu0 %1619  ;;  %v2109_v21 = vsel %vm2082_vm7, %v2076_v44, %v5075_v18  ;;  %v5863_v18 = vld [vmem:[#allocation100_spill] sm:$0xff] }
 0x302   : > { %v2126_v54 = vsel %vm2115_vm8, %v2093_v26, %v1620_v4  ;;  %v2142_v56 = vsel %vm2115_vm8, %v2109_v21, %v1652_v25  ;;  %v5861_v4 = vld [vmem:[#allocation87_spill] sm:$0xff]  ;;  %v2011_v51 = vsel %vm1983_vm4, %v5864_v30, %v5863_v18  ;;  %v5873_v30 = vld [vmem:[#allocation122_spill] sm:$0xff] }
 0x303   : > { %v1995_v42 = vsel %vm1983_vm4, %v5862_v1, %v5861_v4  ;;  %v5865_v25 = vld [vmem:[#allocation19_spill] sm:$0xff]  ;;  %v2044_v2 = vsel %vm2016_vm5, %v2011_v51, %v5866_v63  ;;  %v5871_v4 = vld [vmem:[#allocation101_spill] sm:$0xff] }
 0x304   : > { %v2028_v37 = vsel %vm2016_vm5, %v1995_v42, %v5865_v25  ;;  %v2012_v1 = vsel %vm1983_vm4, %v3955_v6, %v5871_v4  ;;  %v5872_v42 = vld [vmem:[#allocation23_spill] sm:$0xff] }
 0x305   : > { %v1938_v17 = vpop.permute.xlu1 %1937  ;;  %v1906_v14 = vpop.permute.xlu0 %1905  ;;  %v2045_v51 = vsel %vm2016_vm5, %v2012_v1, %v5873_v30  ;;  %v5874_v25 = vld [vmem:[#allocation131_spill] sm:$0xff] }
 0x306   : > { %v2240_v47 = vsel %vm2214_vm11, %v2207_v36, %v1938_v17  ;;  %v2224_v52 = vsel %vm2214_vm11, %v2191_v28, %v1906_v14  ;;  %v5867_v28 = vld [vmem:[#allocation128_spill] sm:$0xff]  ;;  %v5868_v17 = vld [vmem:[#allocation137_spill] sm:$0xff]  ;;  %v5875_v63 = vld [vmem:[#allocation139_spill] sm:$0xff] }
 0x307   : > { %2858 = vmatmul.mubr.msk.f32.gmra.mxu0 %vm2259_vm12, %v2224_v52  ;;  %2882 = vmatmul.mubr.msk.f32.gmra.mxu1 %vm2259_vm12, %v2240_v47  ;;  %v2061_v36 = vsel %vm2049_vm6, %v2028_v37, %v5867_v28  ;;  %v2077_v14 = vsel %vm2049_vm6, %v2044_v2, %v5868_v17  ;;  %v2078_v2 = vsel %vm2049_vm6, %v2045_v51, %v5875_v63 }
 0x309   : > { %v1654_v32 = vpop.permute.xlu1 %1653  ;;  %v1622_v58 = vpop.permute.xlu0 %1621 }
 0x30d   : > { %v1748_v8 = vpop.permute.xlu1 %1747  ;;  %v1716_v39 = vpop.permute.xlu0 %1715 }
 0x30e   : > { %v2159_v41 = vsel %vm2148_vm9, %v2126_v54, %v1716_v39  ;;  %v2175_v35 = vsel %vm2148_vm9, %v2142_v56, %v1748_v8  ;;  %v5869_v8 = vld [vmem:[#allocation145_spill] sm:$0xff] }
 0x30f   : > { %v2094_v39 = vsel %vm2082_vm7, %v2061_v36, %v5869_v8  ;;  %v5876_v36 = vld [vmem:[#allocation148_spill] sm:$0xff] }
 0x310   : > { %v2127_v31 = vsel %vm2115_vm8, %v2094_v39, %v1622_v58 }
 0x311   : > { %v1750_v20 = vpop.permute.xlu1 %1749  ;;  %v1718_v34 = vpop.permute.xlu0 %1717 }
 0x312   : > { %v2160_v53 = vsel %vm2148_vm9, %v2127_v31, %v1718_v34 }
 0x315   : > { %v1844_v0 = vpop.permute.xlu1 %1843  ;;  %v1812_v7 = vpop.permute.xlu0 %1811 }
 0x316   : > { %v2192_v3 = vsel %vm2181_vm10, %v2159_v41, %v1812_v7  ;;  %v2208_v23 = vsel %vm2181_vm10, %v2175_v35, %v1844_v0  ;;  %v2110_v0 = vsel %vm2082_vm7, %v2077_v14, %v5098_v48 }
 0x317   : > { %v2143_v7 = vsel %vm2115_vm8, %v2110_v0, %v1654_v32 }
 0x318   : > { %v2176_v50 = vsel %vm2148_vm9, %v2143_v7, %v1750_v20 }
 0x319   : > { %v1814_v24 = vpop.permute.xlu1 %1813  ;;  %v5137_v61 = vpop.permute.xlu0 %1554 }
 0x31a   : > { %v2193_v5 = vsel %vm2181_vm10, %v2160_v53, %v1814_v24  ;;  %v2111_v6 = vsel %vm2082_vm7, %v2078_v2, %v5137_v61  ;;  %v5885_v2 = vld [vmem:[#allocation91_spill] sm:$0xff] }
 0x31d   : > { %v1908_v19 = vpop.permute.xlu1 %1907  ;;  %v1846_v33 = vpop.permute.xlu0 %1845 }
 0x31e   : > { %v2225_v10 = vsel %vm2214_vm11, %v2192_v3, %v1908_v19  ;;  %v2209_v45 = vsel %vm2181_vm10, %v2176_v50, %v1846_v33 }
 0x31f   : > { %2860 = vmatprep.mubr.msk.f32.mxu0 %vm2259_vm12, %v2225_v10 }
 0x321   : > { %v5158_v46 = vpop.permute.xlu1 %1556  ;;  %v1940_v29 = vpop.permute.xlu0 %1939 }
 0x322   : > { %v2241_v60 = vsel %vm2214_vm11, %v2208_v23, %v1940_v29  ;;  %v5870_v29 = vld [vmem:[#allocation88_spill] sm:$0xff] }
 0x323   : > { %2884 = vmatprep.mubr.msk.f32.mxu1 %vm2259_vm12, %v2241_v60  ;;  %v1996_v60 = vsel %vm1983_vm4, %v3704_v13, %v5870_v29 }
 0x324   : > { %v2029_v18 = vsel %vm2016_vm5, %v1996_v60, %v5872_v42 }
 0x325   : > { %v1656_v47 = vpop.permute.xlu1 %1655  ;;  %v1624_v52 = vpop.permute.xlu0 %1623  ;;  %v2062_v37 = vsel %vm2049_vm6, %v2029_v18, %v5874_v25 }
 0x326   : > { %v2095_v17 = vsel %vm2082_vm7, %v2062_v37, %v5876_v36  ;;  %v2144_v14 = vsel %vm2115_vm8, %v2111_v6, %v1656_v47  ;;  %v5884_v37 = vld [vmem:[#allocation90_spill] sm:$0xff] }
 0x327   : > { %v2128_v8 = vsel %vm2115_vm8, %v2095_v17, %v1624_v52  ;;  %v5877_v52 = vld [vmem:[#allocation89_spill] sm:$0xff]  ;;  %v1998_v63 = vsel %vm1983_vm4, %v5781_v22, %v5884_v37  ;;  %v5887_v17 = vld [vmem:[#allocation104_spill] sm:$0xff] }
 0x328   : > { %v2015_v6 = vsel %vm1983_vm4, %v5782_v27, %v5887_v17 }
 0x329   : > { %v1942_v15 = vpop.permute.xlu1 %1941  ;;  %v1910_v38 = vpop.permute.xlu0 %1909 }
 0x32a   : > { %v2242_v55 = vsel %vm2214_vm11, %v2209_v45, %v1942_v15  ;;  %v2226_v26 = vsel %vm2214_vm11, %v2193_v5, %v1910_v38  ;;  %v1997_v15 = vsel %vm1983_vm4, %v3684_v43, %v5877_v52  ;;  %v5878_v38 = vld [vmem:[#allocation102_spill] sm:$0xff]  ;;  %v5892_v52 = vld [vmem:[#allocation133_spill] sm:$0xff] }
 0x32b   : > { %2861 = vmatmul.mubr.msk.f32.gmra.mxu0 %vm2259_vm12, %v2226_v26  ;;  %2885 = vmatmul.mubr.msk.f32.gmra.mxu1 %vm2259_vm12, %v2242_v55  ;;  %v2013_v55 = vsel %vm1983_vm4, %v3948_v57, %v5878_v38  ;;  %v5879_v26 = vld [vmem:[#allocation22_spill] sm:$0xff] }
 0x32d   : > { %v5190_v48 = vpop.permute.xlu1 %1657  ;;  %v5192_v32 = vpop.permute.xlu0 %1625 }
 0x331   : > { %v1752_v58 = vpop.permute.xlu1 %1751  ;;  %v1720_v20 = vpop.permute.xlu0 %1719 }
 0x332   : > { %v2177_v39 = vsel %vm2148_vm9, %v2144_v14, %v1752_v58  ;;  %v2161_v0 = vsel %vm2148_vm9, %v2128_v8, %v1720_v20  ;;  %v2030_v58 = vsel %vm2016_vm5, %v1997_v15, %v5879_v26  ;;  %v5880_v20 = vld [vmem:[#allocation121_spill] sm:$0xff] }
 0x335   : > { %v1754_v34 = vpop.permute.xlu1 %1753  ;;  %v1722_v24 = vpop.permute.xlu0 %1721 }
 0x338   : > { %v2847_v16 = vpop.f32.mrf.mxu0  ;;  %v2871_v49 = vpop.f32.mrf.mxu1 }
 0x339   : > { %v2432_v54 = vadd.f32 %v2847_v16, %v5197_v40  ;;  %v2512_v62 = vadd.f32 %v2871_v49, %v5197_v40  ;;  %v1848_v12 = vpop.permute.xlu1 %1847  ;;  %v1816_v41 = vpop.permute.xlu0 %1815  ;;  %v2046_v16 = vsel %vm2016_vm5, %v2013_v55, %v5880_v20  ;;  %v5881_v49 = vld [vmem:[#allocation130_spill] sm:$0xff] }
 0x33a   : > { %v2506_v11 = vpop.f32.mrf.mxu1  ;;  %v2426_v44 = vpop.f32.mrf.mxu0  ;;  %v2210_v7 = vsel %vm2181_vm10, %v2177_v39, %v1848_v12  ;;  %v2194_v31 = vsel %vm2181_vm10, %v2161_v0, %v1816_v41 }
 0x33b   : > { %v2586_v3 = vmax.f32 %v2432_v54, 0.0  ;;  %v2602_v19 = vmax.f32 %v2512_v62, 0.0  ;;  %v2507_v33 = vadd.f32 %v5197_v40, %v2506_v11  ;;  %v2427_v21 = vadd.f32 %v5197_v40, %v2426_v44  ;;  %v5882_v62 = vld [vmem:[#allocation59_spill] sm:$0xff] }
 0x33c   : > { %v2063_v54 = vsel %vm2049_vm6, %v2030_v58, %v5881_v49  ;;  %v2079_v12 = vsel %vm2049_vm6, %v2046_v16, %v5882_v62  ;;  %v5883_v44 = vld [vmem:[#allocation147_spill] sm:$0xff]  ;;  %v5893_v16 = vld [vmem:[#allocation140_spill] sm:$0xff] }
 0x33d   : > { %2618 = vst [vmem:[%s5204_s9 + $0x8] sm:$0xff] %v2586_v3  ;;  %2634 = vst [vmem:[%s5204_s9 + $0x88] sm:$0xff] %v2602_v19  ;;  %v2601_v10 = vmax.f32 %v2507_v33, 0.0  ;;  %v2585_v56 = vmax.f32 %v2427_v21, 0.0  ;;  %v5208_v35 = vpop.permute.xlu1 %1558  ;;  %v5210_v23 = vpop.permute.xlu0 %1526  ;;  %v2096_v43 = vsel %vm2082_vm7, %v2063_v54, %v5883_v44  ;;  %v2112_v57 = vsel %vm2082_vm7, %v2079_v12, %v5158_v46  ;;  %v5894_v54 = vld [vmem:[#allocation141_spill] sm:$0xff] }
 0x33e   : > { %v2145_v3 = vsel %vm2115_vm8, %v2112_v57, %v5190_v48  ;;  %v2129_v19 = vsel %vm2115_vm8, %v2096_v43, %v5192_v32 }
 0x33f   : > { %2633 = vst [vmem:[%s5204_s9 + $0x80] sm:$0xff] %v2601_v10  ;;  %2617 = vst [vmem:[%s5204_s9] sm:$0xff] %v2585_v56  ;;  %v2178_v33 = vsel %vm2148_vm9, %v2145_v3, %v1754_v34  ;;  %v2162_v21 = vsel %vm2148_vm9, %v2129_v19, %v1722_v24 }
 0x341   : > { %v1850_v28 = vpop.permute.xlu1 %1849  ;;  %v1818_v13 = vpop.permute.xlu0 %1817 }
 0x342   : > { %v2211_v10 = vsel %vm2181_vm10, %v2178_v33, %v1850_v28  ;;  %v2195_v56 = vsel %vm2181_vm10, %v2162_v21, %v1818_v13  ;;  %v1999_v28 = vsel %vm1983_vm4, %v5783_v9, %v5885_v2  ;;  %v5886_v13 = vld [vmem:[#allocation103_spill] sm:$0xff]  ;;  %v5895_v33 = vld [vmem:[#allocation132_spill] sm:$0xff] }
 0x343   : > { %v2014_v36 = vsel %vm1983_vm4, %v5780_v59, %v5886_v13 }
 0x345   : > { %v1944_v50 = vpop.permute.xlu1 %1943  ;;  %v1912_v53 = vpop.permute.xlu0 %1911 }
 0x346   : > { %v2243_v5 = vsel %vm2214_vm11, %v2210_v7, %v1944_v50  ;;  %v2227_v45 = vsel %vm2214_vm11, %v2194_v31, %v1912_v53  ;;  %v5888_v31 = vld [vmem:[#allocation115_spill] sm:$0xff]  ;;  %v5889_v50 = vld [vmem:[#allocation116_spill] sm:$0xff] }
 0x347   : > { %2863 = vmatprep.mubr.msk.f32.mxu0 %vm2259_vm12, %v2227_v45  ;;  %2887 = vmatprep.mubr.msk.f32.mxu1 %vm2259_vm12, %v2243_v5  ;;  %v2032_v9 = vsel %vm2016_vm5, %v1999_v28, %v5888_v31  ;;  %v2031_v53 = vsel %vm2016_vm5, %v1998_v63, %v5889_v50  ;;  %v5890_v5 = vld [vmem:[#allocation123_spill] sm:$0xff]  ;;  %v5891_v45 = vld [vmem:[#allocation124_spill] sm:$0xff] }
 0x348   : > { %v2048_v59 = vsel %vm2016_vm5, %v2015_v6, %v5890_v5  ;;  %v2047_v27 = vsel %vm2016_vm5, %v2014_v36, %v5891_v45  ;;  %v2064_v15 = vsel %vm2049_vm6, %v2031_v53, %v5892_v52  ;;  %v2065_v21 = vsel %vm2049_vm6, %v2032_v9, %v5895_v33 }
 0x349   : > { %v5242_v61 = vpop.permute.xlu1 %1560  ;;  %v5244_v47 = vpop.permute.xlu0 %1528  ;;  %v2081_v49 = vsel %vm2049_vm6, %v2048_v59, %v5893_v16  ;;  %v2080_v62 = vsel %vm2049_vm6, %v2047_v27, %v5894_v54  ;;  %v2097_v12 = vsel %vm2082_vm7, %v2064_v15, %v5210_v23 }
 0x34a   : > { %v2113_v43 = vsel %vm2082_vm7, %v2080_v62, %v5208_v35 }
 0x34d   : > { %v1660_v41 = vpop.permute.xlu1 %1659  ;;  %v1628_v11 = vpop.permute.xlu0 %1627 }
 0x34e   : > { %v2130_v57 = vsel %vm2115_vm8, %v2097_v12, %v1628_v11 }
 0x351   : > { %v1946_v29 = vpop.permute.xlu1 %1945  ;;  %v1914_v60 = vpop.permute.xlu0 %1913 }
 0x352   : > { %v2244_v4 = vsel %vm2214_vm11, %v2211_v10, %v1946_v29  ;;  %v2228_v46 = vsel %vm2214_vm11, %v2195_v56, %v1914_v60  ;;  %v2114_v10 = vsel %vm2082_vm7, %v2081_v49, %v5242_v61  ;;  %v2146_v56 = vsel %vm2115_vm8, %v2113_v43, %v1660_v41 }
 0x353   : > { %2864 = vmatmul.mubr.msk.f32.gmra.mxu0 %vm2259_vm12, %v2228_v46  ;;  %2888 = vmatmul.mubr.msk.f32.gmra.mxu1 %vm2259_vm12, %v2244_v4  ;;  %v2098_v29 = vsel %vm2082_vm7, %v2065_v21, %v5244_v47 }
 0x355   : > { %v1662_v48 = vpop.permute.xlu1 %1661  ;;  %v1630_v32 = vpop.permute.xlu0 %1629 }
 0x356   : > { %v2147_v35 = vsel %vm2115_vm8, %v2114_v10, %v1662_v48  ;;  %v2131_v41 = vsel %vm2115_vm8, %v2098_v29, %v1630_v32 }
 0x359   : > { %v3001_v1 = vpop.permute.xlu1 %3000  ;;  %v1724_v34 = vpop.permute.xlu0 %1723 }
 0x35a   : > { %v3002_v38 = vunpack.i.l.bf16 %v3001_v1  ;;  %v3003_v44 = vunpack.i.h.bf16 %v3001_v1  ;;  %v2163_v23 = vsel %vm2148_vm9, %v2130_v57, %v1724_v34 }
 0x35c   : > { %v2850_v42 = vpop.f32.mrf.mxu0  ;;  %v2874_v24 = vpop.f32.mrf.mxu1  ;;  %v2179_v11 = vsel %vm2148_vm9, %v2146_v56, %v3002_v38  ;;  %v2180_v1 = vsel %vm2148_vm9, %v2147_v35, %v3003_v44 }
 0x35d   : > { %v2442_v18 = vadd.f32 %v2850_v42, %v5197_v40  ;;  %v2522_v30 = vadd.f32 %v2874_v24, %v5197_v40  ;;  %v1820_v51 = vpop.permute.xlu1 %1819  ;;  %v1726_v25 = vpop.permute.xlu0 %1725 }
 0x35e   : > { %v2516_v14 = vpop.f32.mrf.mxu1  ;;  %v2436_v8 = vpop.f32.mrf.mxu0  ;;  %v2196_v60 = vsel %vm2181_vm10, %v2163_v23, %v1820_v51  ;;  %v2164_v34 = vsel %vm2148_vm9, %v2131_v41, %v1726_v25 }
 0x35f   : > { %v2588_v39 = vmax.f32 %v2442_v18, 0.0  ;;  %v2604_v0 = vmax.f32 %v2522_v30, 0.0  ;;  %v2517_v22 = vadd.f32 %v5197_v40, %v2516_v14  ;;  %v2437_v7 = vadd.f32 %v5197_v40, %v2436_v8 }
 0x361   : > { %2620 = vst [vmem:[%s5204_s9 + $0x18] sm:$0xff] %v2588_v39  ;;  %2636 = vst [vmem:[%s5204_s9 + $0x98] sm:$0xff] %v2604_v0  ;;  %v2603_v55 = vmax.f32 %v2517_v22, 0.0  ;;  %v2587_v26 = vmax.f32 %v2437_v7, 0.0  ;;  %v1822_v58 = vpop.permute.xlu1 %1821  ;;  %v3006_v20 = vpop.permute.xlu0 %3005 }
 0x362   : > { %v3008_v3 = vunpack.i.h.bf16 %v3006_v20  ;;  %v3007_v19 = vunpack.i.l.bf16 %v3006_v20  ;;  %v2197_v51 = vsel %vm2181_vm10, %v2164_v34, %v1822_v58 }
 0x363   : > { %2635 = vst [vmem:[%s5204_s9 + $0x90] sm:$0xff] %v2603_v55  ;;  %2619 = vst [vmem:[%s5204_s9 + $0x10] sm:$0xff] %v2587_v26 }
 0x364   : > { %v2212_v47 = vsel %vm2181_vm10, %v2179_v11, %v3007_v19  ;;  %v2213_v48 = vsel %vm2181_vm10, %v2180_v1, %v3008_v3 }
 0x365   : > { %v3011_v4 = vpop.permute.xlu1 %3010  ;;  %v1916_v46 = vpop.permute.xlu0 %1915 }
 0x366   : > { %v3013_v42 = vunpack.i.h.bf16 %v3011_v4  ;;  %v3012_v24 = vunpack.i.l.bf16 %v3011_v4  ;;  %v2229_v61 = vsel %vm2214_vm11, %v2196_v60, %v1916_v46 }
 0x367   : > { %2866 = vmatprep.mubr.msk.f32.mxu0 %vm2259_vm12, %v2229_v61 }
 0x368   : > { %v2245_v18 = vsel %vm2214_vm11, %v2212_v47, %v3012_v24  ;;  %v2246_v30 = vsel %vm2214_vm11, %v2213_v48, %v3013_v42 }
 0x369   : > { %v1918_v37 = vpop.permute.xlu0 %1917  ;;  %2890 = vmatprep.mubr.msk.f32.mxu1 %vm2259_vm12, %v2245_v18 }
 0x36a   : > { %v2230_v32 = vsel %vm2214_vm11, %v2197_v51, %v1918_v37  ;;  %2891 = vmatmul.mubr.msk.f32.gmra.mxu1 %vm2259_vm12, %v2246_v30 }
 0x36b   : > { %2867 = vmatmul.mubr.msk.f32.gmra.mxu0 %vm2259_vm12, %v2230_v32 }
 0x380   : > { %v2853_v25 = vpop.f32.mrf.mxu0  ;;  %v2877_v63 = vpop.f32.mrf.mxu1 }
 0x381   : > { %v2452_v2 = vadd.f32 %v2853_v25, %v5197_v40  ;;  %v2532_v28 = vadd.f32 %v2877_v63, %v5197_v40 }
 0x382   : > { %v2446_v13 = vpop.f32.mrf.mxu0  ;;  %v2526_v36 = vpop.f32.mrf.mxu1 }
 0x383   : > { %v2590_v17 = vmax.f32 %v2452_v2, 0.0  ;;  %v2606_v6 = vmax.f32 %v2532_v28, 0.0  ;;  %v2447_v14 = vadd.f32 %v5197_v40, %v2446_v13  ;;  %v2527_v8 = vadd.f32 %v5197_v40, %v2526_v36 }
 0x385   : > { %2622 = vst [vmem:[%s5204_s9 + $0x28] sm:$0xff] %v2590_v17  ;;  %2638 = vst [vmem:[%s5204_s9 + $0xa8] sm:$0xff] %v2606_v6  ;;  %v2589_v39 = vmax.f32 %v2447_v14, 0.0  ;;  %v2605_v0 = vmax.f32 %v2527_v8, 0.0 }
 0x387   : > { %2621 = vst [vmem:[%s5204_s9 + $0x20] sm:$0xff] %v2589_v39  ;;  %2637 = vst [vmem:[%s5204_s9 + $0xa0] sm:$0xff] %v2605_v0 }
 0x3a4   : > { %v2856_v22 = vpop.f32.mrf.mxu0  ;;  %v2880_v7 = vpop.f32.mrf.mxu1 }
 0x3a5   : > { %v2462_v31 = vadd.f32 %v2856_v22, %v5197_v40  ;;  %v2542_v9 = vadd.f32 %v2880_v7, %v5197_v40 }
 0x3a6   : > { %v2456_v50 = vpop.f32.mrf.mxu0  ;;  %v2536_v53 = vpop.f32.mrf.mxu1 }
 0x3a7   : > { %v2592_v5 = vmax.f32 %v2462_v31, 0.0  ;;  %v2608_v59 = vmax.f32 %v2542_v9, 0.0  ;;  %v2457_v45 = vadd.f32 %v5197_v40, %v2456_v50  ;;  %v2537_v27 = vadd.f32 %v5197_v40, %v2536_v53 }
 0x3a9   : > { %2624 = vst [vmem:[%s5204_s9 + $0x38] sm:$0xff] %v2592_v5  ;;  %2640 = vst [vmem:[%s5204_s9 + $0xb8] sm:$0xff] %v2608_v59  ;;  %v2591_v52 = vmax.f32 %v2457_v45, 0.0  ;;  %v2607_v15 = vmax.f32 %v2537_v27, 0.0 }
 0x3ab   : > { %2623 = vst [vmem:[%s5204_s9 + $0x30] sm:$0xff] %v2591_v52  ;;  %2639 = vst [vmem:[%s5204_s9 + $0xb0] sm:$0xff] %v2607_v15 }
 0x3c7   : > { %v2859_v38 = vpop.f32.mrf.mxu0  ;;  %v2883_v55 = vpop.f32.mrf.mxu1 }
 0x3c8   : > { %v2472_v26 = vadd.f32 %v2859_v38, %v5197_v40  ;;  %v2552_v58 = vadd.f32 %v2883_v55, %v5197_v40 }
 0x3c9   : > { %v2466_v20 = vpop.f32.mrf.mxu0  ;;  %v2546_v16 = vpop.f32.mrf.mxu1 }
 0x3ca   : > { %v2594_v49 = vmax.f32 %v2472_v26, 0.0  ;;  %v2610_v54 = vmax.f32 %v2552_v58, 0.0  ;;  %v2467_v62 = vadd.f32 %v5197_v40, %v2466_v20  ;;  %v2547_v12 = vadd.f32 %v5197_v40, %v2546_v16 }
 0x3cc   : > { %2626 = vst [vmem:[%s5204_s9 + $0x48] sm:$0xff] %v2594_v49  ;;  %2642 = vst [vmem:[%s5204_s9 + $0xc8] sm:$0xff] %v2610_v54  ;;  %v2593_v44 = vmax.f32 %v2467_v62, 0.0  ;;  %v2609_v43 = vmax.f32 %v2547_v12, 0.0 }
 0x3ce   : > { %2625 = vst [vmem:[%s5204_s9 + $0x40] sm:$0xff] %v2593_v44  ;;  %2641 = vst [vmem:[%s5204_s9 + $0xc0] sm:$0xff] %v2609_v43 }
 0x3eb   : > { %v2862_v57 = vpop.f32.mrf.mxu0  ;;  %v2886_v3 = vpop.f32.mrf.mxu1 }
 0x3ec   : > { %v2482_v19 = vadd.f32 %v2862_v57, %v5197_v40  ;;  %v2562_v33 = vadd.f32 %v2886_v3, %v5197_v40 }
 0x3ed   : > { %v2476_v21 = vpop.f32.mrf.mxu0  ;;  %v2556_v10 = vpop.f32.mrf.mxu1 }
 0x3ee   : > { %v2596_v56 = vmax.f32 %v2482_v19, 0.0  ;;  %v2612_v23 = vmax.f32 %v2562_v33, 0.0  ;;  %v2477_v29 = vadd.f32 %v5197_v40, %v2476_v21  ;;  %v2557_v35 = vadd.f32 %v5197_v40, %v2556_v10 }
 0x3f0   : > { %2628 = vst [vmem:[%s5204_s9 + $0x58] sm:$0xff] %v2596_v56  ;;  %2644 = vst [vmem:[%s5204_s9 + $0xd8] sm:$0xff] %v2612_v23  ;;  %v2595_v11 = vmax.f32 %v2477_v29, 0.0  ;;  %v2611_v60 = vmax.f32 %v2557_v35, 0.0 }
 0x3f2   : > { %2627 = vst [vmem:[%s5204_s9 + $0x50] sm:$0xff] %v2595_v11  ;;  %2643 = vst [vmem:[%s5204_s9 + $0xd0] sm:$0xff] %v2611_v60 }
 0x413   : > { %v2865_v4 = vpop.f32.mrf.mxu0  ;;  %v2889_v46 = vpop.f32.mrf.mxu1 }
 0x414   : > { %v2492_v1 = vadd.f32 %v2865_v4, %v5197_v40  ;;  %v2572_v42 = vadd.f32 %v2889_v46, %v5197_v40 }
 0x415   : > { %v2486_v24 = vpop.f32.mrf.mxu0  ;;  %v2566_v61 = vpop.f32.mrf.mxu1 }
 0x416   : > { %v2598_v41 = vmax.f32 %v2492_v1, 0.0  ;;  %v2614_v47 = vmax.f32 %v2572_v42, 0.0  ;;  %v2487_v48 = vadd.f32 %v5197_v40, %v2486_v24  ;;  %v2567_v34 = vadd.f32 %v5197_v40, %v2566_v61 }
 0x418   : > { %2630 = vst [vmem:[%s5204_s9 + $0x68] sm:$0xff] %v2598_v41  ;;  %2646 = vst [vmem:[%s5204_s9 + $0xe8] sm:$0xff] %v2614_v47  ;;  %v2597_v18 = vmax.f32 %v2487_v48, 0.0  ;;  %v2613_v30 = vmax.f32 %v2567_v34, 0.0 }
 0x41a   : > { %2629 = vst [vmem:[%s5204_s9 + $0x60] sm:$0xff] %v2597_v18  ;;  %2645 = vst [vmem:[%s5204_s9 + $0xe0] sm:$0xff] %v2613_v30 }
 0x42a   : > { %v2892_v51 = vpop.f32.mrf.mxu1 }
 0x42b   : > { %v2582_v37 = vadd.f32 %v2892_v51, %v5197_v40  ;;  %v2868_v32 = vpop.f32.mrf.mxu0 }
 0x42c   : > { %v2502_v25 = vadd.f32 %v2868_v32, %v5197_v40  ;;  %v2576_v63 = vpop.f32.mrf.mxu1 }
 0x42d   : > { %v2616_v2 = vmax.f32 %v2582_v37, 0.0  ;;  %v2577_v28 = vadd.f32 %v5197_v40, %v2576_v63  ;;  %v2496_v13 = vpop.f32.mrf.mxu0 }
 0x42e   : > { %v2600_v36 = vmax.f32 %v2502_v25, 0.0  ;;  %v2497_v17 = vadd.f32 %v5197_v40, %v2496_v13 }
 0x42f   : > { %2648 = vst [vmem:[%s5204_s9 + $0xf8] sm:$0xff] %v2616_v2  ;;  %v2615_v6 = vmax.f32 %v2577_v28, 0.0 }
 0x430   : > { %2632 = vst [vmem:[%s5204_s9 + $0x78] sm:$0xff] %v2600_v36  ;;  %v2599_v14 = vmax.f32 %v2497_v17, 0.0 }
 0x431   : > { %2647 = vst [vmem:[%s5204_s9 + $0xf0] sm:$0xff] %v2615_v6 }
 0x432   : > { %2631 = vst [vmem:[%s5204_s9 + $0x70] sm:$0xff] %v2599_v14 }
 0x433   : > { %3081 = shalt.err (!%p3078_p0)
}
 0x434   : > { %s3082_s29 = scalar_lea.hbm %s5390_s27, 4096  ;;  %s3086_s23 = scalar_lea.hbm %s5442_s3, 8192 }
 0x435   : > { %p3083_p5 = scmp.ne.s32.totalorder %s5390_s27, %s3082_s29  ;;  %p3087_p4 = scmp.lt.s32.totalorder %s5390_s27, %s5442_s3 }
 0x436   : > { %p3088_p6 = scmp.lt.s32.totalorder %s3086_s23, %s3082_s29 }
 0x437   : > { %p3084_p2 = pnand %p3083_p5, %p5896_p11 }
 0x438   : > { %p3089_p8 = por %p3088_p6, %p3087_p4 }
 0x439   : > { %p3085_p1 = pneg %p3084_p2 }
 0x43b   : > { %p3090_p3 = pnand %p3089_p8, %p3085_p1 }
 0x43d   : > { %3093 = shalt.err (!%p3090_p3)
}
 0x43e   : > { %s3169_s9 = smov 128  }
 0x43f   : > { %2909 = dma.vmem_to_hbm [thread:$0]  (%p5896_p11), %s5393_s10, 4096, %s5390_s27, %s2650_s16, %s3169_s9, %s3169_s9, %s3158_s30  }
 0x440 PF: > { %s2678_s7 = sand.u32 1, %s3124_s12   ;;  %p5897_p7 = scmp.ne.s32.totalorder %s5570_s19, 0 }
 0x441   : > { %p5898_p9 = scmp.ge.s32.totalorder %s3136_s15, 2  ;;  %s2679_s11 = scalar_lea.sflag [#allocation4], %s2678_s7 }
 0x443   : > { %p2920_p10 = pnand %p5898_p9, %p5897_p7 }
 0x445   : > { %p2921_p12 = pneg %p2920_p10 }
 0x447   : > { %3119 = dma.done.wait (%p2921_p12), %s2679_s11, 4096  }
 0x448   : > { %3121 = vsyncadd (%p2921_p12), %s2679_s11, 4294963200  ;;  %p17_p13 = scmp.ge.s32.totalorder %s3244_s24, 4   ;;  %s5899_s12 = smov %s3128_s13 }
 0x449   : > { %s5900_s13 = smov %s3132_s14  ;;  %s5901_s14 = smov %s3264_s5 }
 0x44a   : > { %s5902_s15 = smov %s3244_s24  ;;  %19 = sbr.rel (!%p17_p13) target bundleno = 6 (0x6), region = 81 }
 0x44f   :  { %2684 = vsyncpa [#allocation3], 1 }
 0x450   :  { %2686 = vsyncpa [#allocation3 + $0x1], 1 }
 0x451   :  { %2687 = vsyncpa [#allocation6], 1 }
 0x452   :  { %2688 = vsyncpa [#allocation4], 1 }
 0x453   :  { %2690 = vsyncpa [#allocation4 + $0x1], 1 }

</bundles_post_ra>
